<compile_context>
chip_gen: v7x
topology: tpu7x:2x2x1
jax: 0.10.0
libtpu: 0.0.40
codegen_flags: <defaults>
</compile_context>

<pallas_src>
import math

import jax
import jax.numpy as jnp
from jax import lax
from jax.experimental import pallas as pl
from jax.experimental.pallas import tpu as pltpu

# ----------------------------------------------------------------------------
# Synthetic config (mirrors the config.model.* fields used by the forward pass)
# ----------------------------------------------------------------------------
VOCAB       = 64          # synthetic vocab for the stand-in bert_layer_0
HIDDEN      = 32          # MODELS[base_model][2] hidden_size
FFN         = 64
N_LAYERS    = 2           # TODO(synk): stands in for the full pretrained BERT encoder stack
MAX_LEN     = 8           # config.model.max_len
NUM_CLASS   = 4           # config.model.num_class
LINEAR_DIM  = 16          # config.model.tail.linear_dim
TAIL_ENABLE = True        # config.model.tail.linear
DTYPE       = jnp.float32
MM_DTYPE    = jnp.bfloat16  # MXU operand dtype (f32 accumulation)

# ---- packed-slab layout constants -------------------------------------------------------
VSLAB_W   = 128                         # lane width of the per-layer f32 vector slab
MISC_W    = max(HIDDEN, MAX_LEN * 4)    # lane width of the f32 misc slab (== 32 here)
ROW_POS   = VOCAB                       # misc slab row offsets
ROW_LN_G  = VOCAB + MAX_LEN
ROW_LN_B  = ROW_LN_G + 1
ROW_BC    = ROW_LN_G + 2
MISC_ROWS = ROW_BC + 1


# ----------------------------------------------------------------------------
# In-kernel helpers
# ----------------------------------------------------------------------------
def _layernorm(x, g, b, eps=1e-12):
    mu = jnp.mean(x, axis=-1, keepdims=True)
    var = jnp.mean(jnp.square(x - mu), axis=-1, keepdims=True)
    return (x - mu) * jax.lax.rsqrt(var + eps) * g + b


def _encoder_from_refs(ids_ref, mask_ref, misc_ref, w1s_ref, w2s_ref, vs_ref):
    """Embedding gather + LN + N_LAYERS single-head encoder layers, fully in-kernel.

    Returns the final hidden states as a [B*S, HIDDEN] f32 value (never leaves VMEM).
    """
    B, S = mask_ref.shape
    BS = B * S
    H, F = HIDDEN, FFN

    # --- bert embeddings: exact one-hot MXU gather + positional add + LayerNorm ----------
    onehot = (ids_ref[...] ==
              lax.broadcasted_iota(jnp.int32, (BS, VOCAB), 1)).astype(jnp.float32)
    tok_table = misc_ref[0:VOCAB, :][:, :H]                       # [VOCAB, H] f32
    pos_table = misc_ref[ROW_POS:ROW_POS + MAX_LEN, :][:, :H]     # [MAX_LEN, H] f32
    emb = jnp.dot(onehot, tok_table, preferred_element_type=jnp.float32)   # [BS, H]
    emb = (emb.reshape(B, S, H) + pos_table[None, :S, :]).reshape(BS, H)
    g = misc_ref[ROW_LN_G:ROW_LN_G + 1, :][:, :H]
    b = misc_ref[ROW_LN_B:ROW_LN_B + 1, :][:, :H]
    x = _layernorm(emb, g, b)                                     # [BS, H] f32

    # --- additive padding bias, per example (no [BS,BS] block-diagonal needed) -----------
    neg_bias = (mask_ref[...] - 1.0) * 1e9                        # [B, S]: 0 valid, -1e9 pad
    inv_sqrt_h = 1.0 / float(H) ** 0.5

    for l in range(N_LAYERS):                 # static Python unroll over stacked layers
        wblk = w1s_ref[l]                     # [H, 4H+F] bf16 : wq|wk|wv | wo | w1
        w2   = w2s_ref[l]                     # [F, H]    bf16
        vblk = vs_ref[l]                      # [8, VSLAB_W] f32 bias / LayerNorm rows
        wqkv = wblk[:, 0:3 * H]
        wo   = wblk[:, 3 * H:4 * H]
        w1   = wblk[:, 4 * H:4 * H + F]
        bqkv = vblk[0:1, 0:3 * H]
        bo   = vblk[1:2, 0:H]
        g1   = vblk[2:3, 0:H]
        b1   = vblk[3:4, 0:H]
        c1   = vblk[4:5, 0:F]
        c2   = vblk[5:6, 0:H]
        g2   = vblk[6:7, 0:H]
        b2   = vblk[7:8, 0:H]

        # fused QKV projection: one [BS,H]@[H,3H] matmul (3x MXU column occupancy)
        qkv = (jnp.dot(x.astype(MM_DTYPE), wqkv,
                       preferred_element_type=jnp.float32) + bqkv).astype(MM_DTYPE)
        qb = qkv[:, 0:H].reshape(B, S, H)
        kb = qkv[:, H:2 * H].reshape(B, S, H)
        vb = qkv[:, 2 * H:3 * H].reshape(B, S, H)

        # per-example attention: [B,S,S] scores, FLOPs linear in B
        sc = jnp.einsum('bqd,bkd->bqk', qb, kb, preferred_element_type=jnp.float32)
        sc = sc * inv_sqrt_h + neg_bias[:, None, :]
        sc = sc - jnp.max(sc, axis=-1, keepdims=True)
        p = jnp.exp(sc)
        attn = p * pl.reciprocal(jnp.sum(p, axis=-1, keepdims=True), approx=True)
        ctx = jnp.einsum('bqk,bkd->bqd', attn.astype(MM_DTYPE), vb,
                         preferred_element_type=jnp.float32).reshape(BS, H)

        h1 = _layernorm(
            x + jnp.dot(ctx.astype(MM_DTYPE), wo, preferred_element_type=jnp.float32) + bo,
            g1, b1)
        # TODO(synk): jax.nn.gelu defaults to the tanh approximation; exact-erf GELU would
        # match HF BERT bit-for-bit, but the encoder stand-in is synthetic anyway.
        ff = jax.nn.gelu(
            jnp.dot(h1.astype(MM_DTYPE), w1, preferred_element_type=jnp.float32) + c1)
        x = _layernorm(
            h1 + jnp.dot(ff.astype(MM_DTYPE), w2, preferred_element_type=jnp.float32) + c2,
            g2, b2)
    return x


# ----------------------------------------------------------------------------
# Fused forward kernels (one pallas_call for the whole model)
# ----------------------------------------------------------------------------
def fused_tail_kernel(ids_ref, mask_ref, misc_ref, w1s_ref, w2s_ref, vs_ref, wc_ref, o_ref):
    """Embeddings + encoder + tail head.

    after_bert_0 (Linear), after_bert_1 (BatchNorm1d eval) and after_bert_3 (Linear) are
    folded in f32 at parameter-prep time into wc [S, H, S*4] / bc; after_bert_2 (Dropout)
    is identity at inference.
    """
    B, S = mask_ref.shape
    x = _encoder_from_refs(ids_ref, mask_ref, misc_ref, w1s_ref, w2s_ref, vs_ref)
    xb = x.reshape(B, S, HIDDEN)                               # free leading-dim regroup
    bc = misc_ref[ROW_BC:ROW_BC + 1, :][:, :MAX_LEN * 4]       # folded tail bias [1, S*4]
    acc = jnp.zeros((B, MAX_LEN * 4), jnp.float32) + bc
    # Statically-unrolled per-position accumulation: avoids the [BS,LD] -> [B,S*LD]
    # sublane->lane flatten (an XLU relayout); all work stays plain 2-D MXU matmuls,
    # and the BN-folded weights remain in f32 (no bf16 quantization of the fold).
    for s in range(S):
        acc = acc + jnp.dot(xb[:, s, :], wc_ref[s], preferred_element_type=jnp.float32)
    o_ref[...] = acc.astype(o_ref.dtype)


def fused_simple_kernel(ids_ref, mask_ref, misc_ref, w1s_ref, w2s_ref, vs_ref, lin_ref,
                        o_ref):
    """Embeddings + encoder + dropout(identity) + self.linear (tail_enable=False path)."""
    x = _encoder_from_refs(ids_ref, mask_ref, misc_ref, w1s_ref, w2s_ref, vs_ref)
    w = lin_ref[0:HIDDEN, :]
    b = lin_ref[HIDDEN:HIDDEN + 1, :]
    o_ref[...] = (jnp.dot(x, w, preferred_element_type=jnp.float32) + b).astype(o_ref.dtype)


def _cost_estimate(args, out_shape, B, S):
    BS = B * S
    flops = (N_LAYERS * (2 * BS * HIDDEN * 3 * HIDDEN        # fused QKV projection
                         + 4 * B * S * S * HIDDEN            # scores + context
                         + 2 * BS * HIDDEN * HIDDEN          # output projection
                         + 4 * BS * HIDDEN * FFN)            # FFN (both matmuls)
             + 2 * BS * VOCAB * HIDDEN                       # one-hot embedding gather
             + 2 * BS * HIDDEN * MAX_LEN * 4)                # folded tail
    transcendentals = N_LAYERS * (B * S * S + BS * FFN + 2 * BS) + BS
    out_bytes = math.prod(out_shape.shape) * jnp.dtype(out_shape.dtype).itemsize
    bytes_accessed = sum(int(a.size) * a.dtype.itemsize for a in args) + out_bytes
    return pl.CostEstimate(flops=int(flops), transcendentals=int(transcendentals),
                           bytes_accessed=int(bytes_accessed))


# ----------------------------------------------------------------------------
# Deterministic parameter initialization (synthetic, no checkpoint loading)
# ----------------------------------------------------------------------------
def init_params(key):
    ks = jax.random.split(key, 8)

    def nrm(k, shape, scale=0.05):
        return (scale * jax.random.normal(k, shape)).astype(DTYPE)

    layers = []
    for lk in jax.random.split(ks[0], N_LAYERS):
        kk = jax.random.split(lk, 6)
        layers.append(dict(
            wq=nrm(kk[0], (HIDDEN, HIDDEN)), bq=jnp.zeros((1, HIDDEN), DTYPE),
            wk=nrm(kk[1], (HIDDEN, HIDDEN)), bk=jnp.zeros((1, HIDDEN), DTYPE),
            wv=nrm(kk[2], (HIDDEN, HIDDEN)), bv=jnp.zeros((1, HIDDEN), DTYPE),
            wo=nrm(kk[3], (HIDDEN, HIDDEN)), bo=jnp.zeros((1, HIDDEN), DTYPE),
            ln1_g=jnp.ones((1, HIDDEN), DTYPE), ln1_b=jnp.zeros((1, HIDDEN), DTYPE),
            w1=nrm(kk[4], (HIDDEN, FFN)),  c1=jnp.zeros((1, FFN), DTYPE),
            w2=nrm(kk[5], (FFN, HIDDEN)),  c2=jnp.zeros((1, HIDDEN), DTYPE),
            ln2_g=jnp.ones((1, HIDDEN), DTYPE), ln2_b=jnp.zeros((1, HIDDEN), DTYPE),
        ))

    return dict(
        tok_emb=nrm(ks[1], (VOCAB, HIDDEN), 0.1),
        pos_emb=nrm(ks[2], (MAX_LEN, HIDDEN), 0.1),
        emb_ln_g=jnp.ones((1, HIDDEN), DTYPE),
        emb_ln_b=jnp.zeros((1, HIDDEN), DTYPE),
        layers=layers,
        # tail head (tail_enable=True path)
        ab0_w=nrm(ks[3], (HIDDEN, LINEAR_DIM)),
        ab0_b=jnp.zeros((1, LINEAR_DIM), DTYPE),
        bn_mean=jnp.zeros((1, MAX_LEN * LINEAR_DIM), DTYPE),   # running_mean
        bn_var=jnp.ones((1, MAX_LEN * LINEAR_DIM), DTYPE),     # running_var
        bn_g=jnp.ones((1, MAX_LEN * LINEAR_DIM), DTYPE),       # BatchNorm weight
        bn_b=jnp.zeros((1, MAX_LEN * LINEAR_DIM), DTYPE),      # BatchNorm bias
        ab3_w=nrm(ks[4], (MAX_LEN * LINEAR_DIM, MAX_LEN * 4)),
        ab3_b=jnp.zeros((1, MAX_LEN * 4), DTYPE),
        # simple head (tail_enable=False path): self.linear
        lin_w=nrm(ks[5], (HIDDEN, NUM_CLASS)),
        lin_b=jnp.zeros((1, NUM_CLASS), DTYPE),
    )


def prepare_inference_params(params):
    """Pack weights into a few slabs, cast MXU weights to bf16, fold BN + tail Linears (f32)."""
    H, F, S, LD = HIDDEN, FFN, MAX_LEN, LINEAR_DIM
    layers = params['layers']

    w1_rows, w2_rows, v_rows = [], [], []
    for lyr in layers:
        wqkv = jnp.concatenate([lyr['wq'], lyr['wk'], lyr['wv']], axis=1)     # [H, 3H]
        w1_rows.append(jnp.concatenate([wqkv, lyr['wo'], lyr['w1']], axis=1))  # [H, 4H+F]
        w2_rows.append(lyr['w2'])                                              # [F, H]
        bqkv = jnp.concatenate([lyr['bq'], lyr['bk'], lyr['bv']], axis=1)      # [1, 3H]
        rows = [bqkv, lyr['bo'], lyr['ln1_g'], lyr['ln1_b'],
                lyr['c1'], lyr['c2'], lyr['ln2_g'], lyr['ln2_b']]
        v_rows.append(jnp.concatenate(
            [jnp.pad(r, ((0, 0), (0, VSLAB_W - r.shape[1]))) for r in rows], axis=0))
    w_slab1 = jnp.stack(w1_rows, axis=0).astype(MM_DTYPE)     # [L, H, 4H+F] bf16
    w_slab2 = jnp.stack(w2_rows, axis=0).astype(MM_DTYPE)     # [L, F, H]    bf16
    v_slab  = jnp.stack(v_rows, axis=0).astype(DTYPE)         # [L, 8, VSLAB_W] f32

    # Fold BatchNorm1d(eval) into after_bert_3, then fold after_bert_0 in — all in f32.
    scale = params['bn_g'] * jax.lax.rsqrt(params['bn_var'] + 1e-5)            # [1, S*LD]
    w3 = params['ab3_w'] * scale.reshape(-1, 1)                                # [S*LD, S*4]
    b3 = params['ab3_b'] + (params['bn_b'] - params['bn_mean'] * scale) @ params['ab3_w']
    w3_s = w3.reshape(S, LD, S * 4)                                            # [S, LD, S*4]
    wc = jnp.einsum('hd,sdo->sho', params['ab0_w'], w3_s).astype(DTYPE)        # [S, H, S*4]
    bc = (b3 + jnp.einsum('d,sdo->o', params['ab0_b'][0], w3_s)[None, :]).astype(DTYPE)

    def padw(a):
        return jnp.pad(a, ((0, 0), (0, MISC_W - a.shape[1])))
    misc = jnp.concatenate([padw(params['tok_emb']), padw(params['pos_emb']),
                            padw(params['emb_ln_g']), padw(params['emb_ln_b']),
                            padw(bc)], axis=0).astype(DTYPE)                   # [MISC_ROWS, MISC_W]
    assert misc.shape == (MISC_ROWS, MISC_W)

    lin_slab = jnp.concatenate([params['lin_w'], params['lin_b']], axis=0).astype(DTYPE)

    return dict(misc=misc, w_slab1=w_slab1, w_slab2=w_slab2, v_slab=v_slab,
                wc=wc, lin_slab=lin_slab)


# ----------------------------------------------------------------------------
# Forward pass (matches PunctuationRestoration.forward, eval semantics)
# ----------------------------------------------------------------------------
def punc_forward(prep, x_ids, attn_masks):
    if x_ids.ndim == 1:                      # x = x.view(1, x.shape[0])
        x_ids = x_ids[None, :]
        attn_masks = attn_masks[None, :]
    B, S = x_ids.shape

    ids = x_ids.reshape(B * S, 1).astype(jnp.int32)     # one column per token id
    mask = attn_masks.reshape(B, S).astype(DTYPE)

    enc_args = (ids, mask, prep['misc'], prep['w_slab1'], prep['w_slab2'], prep['v_slab'])

    if TAIL_ENABLE:
        assert S == MAX_LEN, "tail head requires seq_len == max_len (BatchNorm1d dims)"
        args = enc_args + (prep['wc'],)
        out_shape = jax.ShapeDtypeStruct((B, MAX_LEN * 4), DTYPE)
        kernel = fused_tail_kernel
    else:
        args = enc_args + (prep['lin_slab'],)
        out_shape = jax.ShapeDtypeStruct((B * S, NUM_CLASS), DTYPE)
        kernel = fused_simple_kernel

    # NOTE: keep grid=() and whole-array VMEM BlockSpecs — total footprint is ~100 KB,
    # far below the scoped-VMEM default on v5e/v6e/v7x.  Do NOT add a grid / tiling /
    # vmem_limit_bytes for "pipelining": there is nothing to pipeline at this size.
    z_flat = pl.pallas_call(
        kernel,
        out_shape=out_shape,
        in_specs=[pl.BlockSpec(memory_space=pltpu.MemorySpace.VMEM)] * len(args),
        out_specs=pl.BlockSpec(memory_space=pltpu.MemorySpace.VMEM),
        cost_estimate=_cost_estimate(args, out_shape, B, S),
        compiler_params=pltpu.CompilerParams(),
    )(*args)

    if TAIL_ENABLE:
        z = z_flat.reshape(-1, MAX_LEN, 4)               # x_flatten.view(-1, max_len, 4)
    else:
        z = z_flat.reshape(B, S, NUM_CLASS)
    # NOTE: self.output (Softmax) is defined but never applied in forward — match that.
    return z


# ----------------------------------------------------------------------------
if __name__ == "__main__":
    key = jax.random.PRNGKey(0)
    pkey, dkey = jax.random.split(key)
    params = init_params(pkey)
    prep = prepare_inference_params(params)

    B = 2
    x_ids = jax.random.randint(dkey, (B, MAX_LEN), 0, VOCAB, dtype=jnp.int32)
    attn_masks = jnp.ones((B, MAX_LEN), dtype=jnp.float32)
    attn_masks = attn_masks.at[1, MAX_LEN - 2:].set(0.0)   # pad last 2 tokens of example 1

    z = punc_forward(prep, x_ids, attn_masks)
    jax.block_until_ready(z)
    assert z.shape == (B, MAX_LEN, 4), z.shape
    assert bool(jnp.all(jnp.isfinite(z)))
    print("KERNEL_OK")
</pallas_src>

<mosaic_0001>
module attributes {stable_mosaic.version = 11 : i64} {
  func.func @fused_tail_kernel(%arg0: memref<16x1xi32, #tpu.memory_space<vmem>>, %arg1: memref<2x8xf32, #tpu.memory_space<vmem>>, %arg2: memref<75x32xf32, #tpu.memory_space<vmem>>, %arg3: memref<2x32x192xbf16, #tpu.memory_space<vmem>>, %arg4: memref<2x64x32xbf16, #tpu.memory_space<vmem>>, %arg5: memref<2x8x128xf32, #tpu.memory_space<vmem>>, %arg6: memref<8x32x32xf32, #tpu.memory_space<vmem>>, %arg7: memref<2x32xf32, #tpu.memory_space<vmem>>) attributes {dimension_semantics = [], scalar_prefetch = 0 : i64, scratch_operands = 0 : i64, tpu.core_type = #tpu.core_type<tc>} {
    %c0 = arith.constant 0 : index
    %c0_0 = arith.constant 0 : index
    %0 = vector.load %arg0[%c0, %c0_0] : memref<16x1xi32, #tpu.memory_space<vmem>>, vector<16x1xi32>
    %1 = tpu.iota {dimensions = array<i32: 1>} : vector<16x64xi32>
    %2 = vector.broadcast %0 : vector<16x1xi32> to vector<16x64xi32>
    %3 = arith.cmpi eq, %2, %1 : vector<16x64xi32>
    %4 = arith.extui %3 : vector<16x64xi1> to vector<16x64xi32>
    %5 = arith.sitofp %4 : vector<16x64xi32> to vector<16x64xf32>
    %c0_1 = arith.constant 0 : index
    %c0_2 = arith.constant 0 : index
    %6 = vector.load %arg2[%c0_1, %c0_2] : memref<75x32xf32, #tpu.memory_space<vmem>>, vector<64x32xf32>
    %c64 = arith.constant 64 : index
    %c0_3 = arith.constant 0 : index
    %7 = vector.load %arg2[%c64, %c0_3] : memref<75x32xf32, #tpu.memory_space<vmem>>, vector<8x32xf32>
    %cst = arith.constant dense<0.000000e+00> : vector<16x32xf32>
    %8 = tpu.matmul %5, %6, %cst {dimension_numbers = #tpu.dot_dimension_numbers<[1], [0], [0], [1], [0, 0, 1, 1], [], []>} : vector<16x64xf32>, vector<64x32xf32>, vector<16x32xf32> -> vector<16x32xf32>
    %9 = vector.shape_cast %8 : vector<16x32xf32> to vector<2x8x32xf32>
    %10 = vector.shape_cast %7 : vector<8x32xf32> to vector<1x8x32xf32>
    %11 = vector.broadcast %10 : vector<1x8x32xf32> to vector<2x8x32xf32>
    %12 = arith.addf %9, %11 : vector<2x8x32xf32>
    %13 = vector.shape_cast %12 : vector<2x8x32xf32> to vector<16x32xf32>
    %c72 = arith.constant 72 : index
    %c0_4 = arith.constant 0 : index
    %14 = vector.load %arg2[%c72, %c0_4] : memref<75x32xf32, #tpu.memory_space<vmem>>, vector<1x32xf32>
    %c73 = arith.constant 73 : index
    %c0_5 = arith.constant 0 : index
    %15 = vector.load %arg2[%c73, %c0_5] : memref<75x32xf32, #tpu.memory_space<vmem>>, vector<1x32xf32>
    %cst_6 = arith.constant dense<0.000000e+00> : vector<16xf32>
    %16 = vector.multi_reduction <add>, %13, %cst_6 [1] : vector<16x32xf32> to vector<16xf32>
    %17 = vector.shape_cast %16 : vector<16xf32> to vector<16x1xf32>
    %cst_7 = arith.constant 3.200000e+01 : f32
    %18 = vector.broadcast %cst_7 : f32 to vector<16x1xf32>
    %19 = arith.divf %17, %18 : vector<16x1xf32>
    %20 = vector.broadcast %19 : vector<16x1xf32> to vector<16x32xf32>
    %21 = arith.subf %13, %20 : vector<16x32xf32>
    %22 = arith.mulf %21, %21 : vector<16x32xf32>
    %cst_8 = arith.constant dense<0.000000e+00> : vector<16xf32>
    %23 = vector.multi_reduction <add>, %22, %cst_8 [1] : vector<16x32xf32> to vector<16xf32>
    %24 = vector.shape_cast %23 : vector<16xf32> to vector<16x1xf32>
    %cst_9 = arith.constant 3.200000e+01 : f32
    %25 = vector.broadcast %cst_9 : f32 to vector<16x1xf32>
    %26 = arith.divf %24, %25 : vector<16x1xf32>
    %27 = vector.broadcast %19 : vector<16x1xf32> to vector<16x32xf32>
    %28 = arith.subf %13, %27 : vector<16x32xf32>
    %cst_10 = arith.constant 9.99999996E-13 : f32
    %29 = vector.broadcast %cst_10 : f32 to vector<16x1xf32>
    %30 = arith.addf %26, %29 : vector<16x1xf32>
    %31 = math.rsqrt %30 : vector<16x1xf32>
    %32 = vector.broadcast %31 : vector<16x1xf32> to vector<16x32xf32>
    %33 = arith.mulf %28, %32 : vector<16x32xf32>
    %34 = vector.broadcast %14 : vector<1x32xf32> to vector<16x32xf32>
    %35 = arith.mulf %33, %34 : vector<16x32xf32>
    %36 = vector.broadcast %15 : vector<1x32xf32> to vector<16x32xf32>
    %37 = arith.addf %35, %36 : vector<16x32xf32>
    %c0_11 = arith.constant 0 : index
    %c0_12 = arith.constant 0 : index
    %38 = vector.load %arg1[%c0_11, %c0_12] : memref<2x8xf32, #tpu.memory_space<vmem>>, vector<2x8xf32>
    %cst_13 = arith.constant 1.000000e+00 : f32
    %39 = vector.broadcast %cst_13 : f32 to vector<2x8xf32>
    %40 = arith.subf %38, %39 : vector<2x8xf32>
    %cst_14 = arith.constant 1.000000e+09 : f32
    %41 = vector.broadcast %cst_14 : f32 to vector<2x8xf32>
    %42 = arith.mulf %40, %41 : vector<2x8xf32>
    %c0_15 = arith.constant 0 : index
    %c0_16 = arith.constant 0 : index
    %c0_17 = arith.constant 0 : index
    %43 = vector.load %arg3[%c0_15, %c0_16, %c0_17] : memref<2x32x192xbf16, #tpu.memory_space<vmem>>, vector<1x32x192xbf16>
    %44 = vector.shape_cast %43 : vector<1x32x192xbf16> to vector<32x192xbf16>
    %c0_18 = arith.constant 0 : index
    %c0_19 = arith.constant 0 : index
    %c0_20 = arith.constant 0 : index
    %45 = vector.load %arg4[%c0_18, %c0_19, %c0_20] : memref<2x64x32xbf16, #tpu.memory_space<vmem>>, vector<1x64x32xbf16>
    %46 = vector.shape_cast %45 : vector<1x64x32xbf16> to vector<64x32xbf16>
    %c0_21 = arith.constant 0 : index
    %c0_22 = arith.constant 0 : index
    %c0_23 = arith.constant 0 : index
    %47 = vector.load %arg5[%c0_21, %c0_22, %c0_23] : memref<2x8x128xf32, #tpu.memory_space<vmem>>, vector<1x8x128xf32>
    %48 = vector.shape_cast %47 : vector<1x8x128xf32> to vector<8x128xf32>
    %49 = vector.extract_strided_slice %44 {offsets = [0, 0], sizes = [32, 96], strides = [1, 1]} : vector<32x192xbf16> to vector<32x96xbf16>
    %50 = vector.extract_strided_slice %44 {offsets = [0, 96], sizes = [32, 32], strides = [1, 1]} : vector<32x192xbf16> to vector<32x32xbf16>
    %51 = vector.extract_strided_slice %44 {offsets = [0, 128], sizes = [32, 64], strides = [1, 1]} : vector<32x192xbf16> to vector<32x64xbf16>
    %52 = vector.extract_strided_slice %48 {offsets = [0, 0], sizes = [1, 96], strides = [1, 1]} : vector<8x128xf32> to vector<1x96xf32>
    %53 = vector.extract_strided_slice %48 {offsets = [1, 0], sizes = [1, 32], strides = [1, 1]} : vector<8x128xf32> to vector<1x32xf32>
    %54 = vector.extract_strided_slice %48 {offsets = [2, 0], sizes = [1, 32], strides = [1, 1]} : vector<8x128xf32> to vector<1x32xf32>
    %55 = vector.extract_strided_slice %48 {offsets = [3, 0], sizes = [1, 32], strides = [1, 1]} : vector<8x128xf32> to vector<1x32xf32>
    %56 = vector.extract_strided_slice %48 {offsets = [4, 0], sizes = [1, 64], strides = [1, 1]} : vector<8x128xf32> to vector<1x64xf32>
    %57 = vector.extract_strided_slice %48 {offsets = [5, 0], sizes = [1, 32], strides = [1, 1]} : vector<8x128xf32> to vector<1x32xf32>
    %58 = vector.extract_strided_slice %48 {offsets = [6, 0], sizes = [1, 32], strides = [1, 1]} : vector<8x128xf32> to vector<1x32xf32>
    %59 = vector.extract_strided_slice %48 {offsets = [7, 0], sizes = [1, 32], strides = [1, 1]} : vector<8x128xf32> to vector<1x32xf32>
    %60 = arith.truncf %37 : vector<16x32xf32> to vector<16x32xbf16>
    %cst_24 = arith.constant dense<0.000000e+00> : vector<16x96xf32>
    %61 = tpu.matmul %60, %49, %cst_24 {dimension_numbers = #tpu.dot_dimension_numbers<[1], [0], [0], [1], [0, 0, 1, 1], [], []>} : vector<16x32xbf16>, vector<32x96xbf16>, vector<16x96xf32> -> vector<16x96xf32>
    %62 = vector.broadcast %52 : vector<1x96xf32> to vector<16x96xf32>
    %63 = arith.addf %61, %62 : vector<16x96xf32>
    %64 = arith.truncf %63 : vector<16x96xf32> to vector<16x96xbf16>
    %65 = vector.extract_strided_slice %64 {offsets = [0, 0], sizes = [16, 32], strides = [1, 1]} : vector<16x96xbf16> to vector<16x32xbf16>
    %66 = vector.shape_cast %65 : vector<16x32xbf16> to vector<2x8x32xbf16>
    %67 = vector.extract_strided_slice %64 {offsets = [0, 32], sizes = [16, 32], strides = [1, 1]} : vector<16x96xbf16> to vector<16x32xbf16>
    %68 = vector.shape_cast %67 : vector<16x32xbf16> to vector<2x8x32xbf16>
    %69 = vector.extract_strided_slice %64 {offsets = [0, 64], sizes = [16, 32], strides = [1, 1]} : vector<16x96xbf16> to vector<16x32xbf16>
    %70 = vector.shape_cast %69 : vector<16x32xbf16> to vector<2x8x32xbf16>
    "tpu.trace_start"() <{level = 10 : i32, message = "bqd,bkd->bqk"}> : () -> ()
    %cst_25 = arith.constant dense<0.000000e+00> : vector<2x8x8xf32>
    %71 = tpu.matmul %66, %68, %cst_25 {dimension_numbers = #tpu.dot_dimension_numbers<[2], [2], [1], [1], [0, 0, 0, 1, 1, 1], [0], [0]>} : vector<2x8x32xbf16>, vector<2x8x32xbf16>, vector<2x8x8xf32> -> vector<2x8x8xf32>
    "tpu.trace_stop"() : () -> ()
    %cst_26 = arith.constant 0.176776692 : f32
    %72 = vector.broadcast %cst_26 : f32 to vector<2x8x8xf32>
    %73 = arith.mulf %71, %72 : vector<2x8x8xf32>
    %74 = vector.shape_cast %42 : vector<2x8xf32> to vector<2x1x8xf32>
    %75 = vector.broadcast %74 : vector<2x1x8xf32> to vector<2x8x8xf32>
    %76 = arith.addf %73, %75 : vector<2x8x8xf32>
    %cst_27 = arith.constant dense<0xFF800000> : vector<2x8xf32>
    %77 = vector.multi_reduction <maximumf>, %76, %cst_27 [2] : vector<2x8x8xf32> to vector<2x8xf32>
    %78 = vector.shape_cast %77 : vector<2x8xf32> to vector<2x8x1xf32>
    %79 = vector.broadcast %78 : vector<2x8x1xf32> to vector<2x8x8xf32>
    %80 = arith.subf %76, %79 : vector<2x8x8xf32>
    %81 = math.exp %80 : vector<2x8x8xf32>
    %cst_28 = arith.constant dense<0.000000e+00> : vector<2x8xf32>
    %82 = vector.multi_reduction <add>, %81, %cst_28 [2] : vector<2x8x8xf32> to vector<2x8xf32>
    %83 = vector.shape_cast %82 : vector<2x8xf32> to vector<2x8x1xf32>
    %84 = tpu.reciprocal %83 {approx = true} : vector<2x8x1xf32> -> vector<2x8x1xf32>
    %85 = vector.broadcast %84 : vector<2x8x1xf32> to vector<2x8x8xf32>
    %86 = arith.mulf %81, %85 : vector<2x8x8xf32>
    %87 = arith.truncf %86 : vector<2x8x8xf32> to vector<2x8x8xbf16>
    "tpu.trace_start"() <{level = 10 : i32, message = "bqk,bkd->bqd"}> : () -> ()
    %cst_29 = arith.constant dense<0.000000e+00> : vector<2x8x32xf32>
    %88 = tpu.matmul %87, %70, %cst_29 {dimension_numbers = #tpu.dot_dimension_numbers<[2], [1], [1], [2], [0, 0, 0, 1, 1, 2], [0], [0]>} : vector<2x8x8xbf16>, vector<2x8x32xbf16>, vector<2x8x32xf32> -> vector<2x8x32xf32>
    "tpu.trace_stop"() : () -> ()
    %89 = vector.shape_cast %88 : vector<2x8x32xf32> to vector<16x32xf32>
    %90 = arith.truncf %89 : vector<16x32xf32> to vector<16x32xbf16>
    %cst_30 = arith.constant dense<0.000000e+00> : vector<16x32xf32>
    %91 = tpu.matmul %90, %50, %cst_30 {dimension_numbers = #tpu.dot_dimension_numbers<[1], [0], [0], [1], [0, 0, 1, 1], [], []>} : vector<16x32xbf16>, vector<32x32xbf16>, vector<16x32xf32> -> vector<16x32xf32>
    %92 = arith.addf %37, %91 : vector<16x32xf32>
    %93 = vector.broadcast %53 : vector<1x32xf32> to vector<16x32xf32>
    %94 = arith.addf %92, %93 : vector<16x32xf32>
    %cst_31 = arith.constant dense<0.000000e+00> : vector<16xf32>
    %95 = vector.multi_reduction <add>, %94, %cst_31 [1] : vector<16x32xf32> to vector<16xf32>
    %96 = vector.shape_cast %95 : vector<16xf32> to vector<16x1xf32>
    %cst_32 = arith.constant 3.200000e+01 : f32
    %97 = vector.broadcast %cst_32 : f32 to vector<16x1xf32>
    %98 = arith.divf %96, %97 : vector<16x1xf32>
    %99 = vector.broadcast %98 : vector<16x1xf32> to vector<16x32xf32>
    %100 = arith.subf %94, %99 : vector<16x32xf32>
    %101 = arith.mulf %100, %100 : vector<16x32xf32>
    %cst_33 = arith.constant dense<0.000000e+00> : vector<16xf32>
    %102 = vector.multi_reduction <add>, %101, %cst_33 [1] : vector<16x32xf32> to vector<16xf32>
    %103 = vector.shape_cast %102 : vector<16xf32> to vector<16x1xf32>
    %cst_34 = arith.constant 3.200000e+01 : f32
    %104 = vector.broadcast %cst_34 : f32 to vector<16x1xf32>
    %105 = arith.divf %103, %104 : vector<16x1xf32>
    %106 = vector.broadcast %98 : vector<16x1xf32> to vector<16x32xf32>
    %107 = arith.subf %94, %106 : vector<16x32xf32>
    %cst_35 = arith.constant 9.99999996E-13 : f32
    %108 = vector.broadcast %cst_35 : f32 to vector<16x1xf32>
    %109 = arith.addf %105, %108 : vector<16x1xf32>
    %110 = math.rsqrt %109 : vector<16x1xf32>
    %111 = vector.broadcast %110 : vector<16x1xf32> to vector<16x32xf32>
    %112 = arith.mulf %107, %111 : vector<16x32xf32>
    %113 = vector.broadcast %54 : vector<1x32xf32> to vector<16x32xf32>
    %114 = arith.mulf %112, %113 : vector<16x32xf32>
    %115 = vector.broadcast %55 : vector<1x32xf32> to vector<16x32xf32>
    %116 = arith.addf %114, %115 : vector<16x32xf32>
    %117 = arith.truncf %116 : vector<16x32xf32> to vector<16x32xbf16>
    %cst_36 = arith.constant dense<0.000000e+00> : vector<16x64xf32>
    %118 = tpu.matmul %117, %51, %cst_36 {dimension_numbers = #tpu.dot_dimension_numbers<[1], [0], [0], [1], [0, 0, 1, 1], [], []>} : vector<16x32xbf16>, vector<32x64xbf16>, vector<16x64xf32> -> vector<16x64xf32>
    %119 = vector.broadcast %56 : vector<1x64xf32> to vector<16x64xf32>
    %120 = arith.addf %118, %119 : vector<16x64xf32>
    %121 = arith.mulf %120, %120 : vector<16x64xf32>
    %122 = arith.mulf %120, %121 : vector<16x64xf32>
    %cst_37 = arith.constant 4.471500e-02 : f32
    %123 = vector.broadcast %cst_37 : f32 to vector<16x64xf32>
    %124 = arith.mulf %123, %122 : vector<16x64xf32>
    %125 = arith.addf %120, %124 : vector<16x64xf32>
    %cst_38 = arith.constant 0.797884583 : f32
    %126 = vector.broadcast %cst_38 : f32 to vector<16x64xf32>
    %127 = arith.mulf %126, %125 : vector<16x64xf32>
    %128 = math.tanh %127 : vector<16x64xf32>
    %cst_39 = arith.constant 1.000000e+00 : f32
    %129 = vector.broadcast %cst_39 : f32 to vector<16x64xf32>
    %130 = arith.addf %129, %128 : vector<16x64xf32>
    %cst_40 = arith.constant 5.000000e-01 : f32
    %131 = vector.broadcast %cst_40 : f32 to vector<16x64xf32>
    %132 = arith.mulf %131, %130 : vector<16x64xf32>
    %133 = arith.mulf %120, %132 : vector<16x64xf32>
    %134 = arith.truncf %133 : vector<16x64xf32> to vector<16x64xbf16>
    %cst_41 = arith.constant dense<0.000000e+00> : vector<16x32xf32>
    %135 = tpu.matmul %134, %46, %cst_41 {dimension_numbers = #tpu.dot_dimension_numbers<[1], [0], [0], [1], [0, 0, 1, 1], [], []>} : vector<16x64xbf16>, vector<64x32xbf16>, vector<16x32xf32> -> vector<16x32xf32>
    %136 = arith.addf %116, %135 : vector<16x32xf32>
    %137 = vector.broadcast %57 : vector<1x32xf32> to vector<16x32xf32>
    %138 = arith.addf %136, %137 : vector<16x32xf32>
    %cst_42 = arith.constant dense<0.000000e+00> : vector<16xf32>
    %139 = vector.multi_reduction <add>, %138, %cst_42 [1] : vector<16x32xf32> to vector<16xf32>
    %140 = vector.shape_cast %139 : vector<16xf32> to vector<16x1xf32>
    %cst_43 = arith.constant 3.200000e+01 : f32
    %141 = vector.broadcast %cst_43 : f32 to vector<16x1xf32>
    %142 = arith.divf %140, %141 : vector<16x1xf32>
    %143 = vector.broadcast %142 : vector<16x1xf32> to vector<16x32xf32>
    %144 = arith.subf %138, %143 : vector<16x32xf32>
    %145 = arith.mulf %144, %144 : vector<16x32xf32>
    %cst_44 = arith.constant dense<0.000000e+00> : vector<16xf32>
    %146 = vector.multi_reduction <add>, %145, %cst_44 [1] : vector<16x32xf32> to vector<16xf32>
    %147 = vector.shape_cast %146 : vector<16xf32> to vector<16x1xf32>
    %cst_45 = arith.constant 3.200000e+01 : f32
    %148 = vector.broadcast %cst_45 : f32 to vector<16x1xf32>
    %149 = arith.divf %147, %148 : vector<16x1xf32>
    %150 = vector.broadcast %142 : vector<16x1xf32> to vector<16x32xf32>
    %151 = arith.subf %138, %150 : vector<16x32xf32>
    %cst_46 = arith.constant 9.99999996E-13 : f32
    %152 = vector.broadcast %cst_46 : f32 to vector<16x1xf32>
    %153 = arith.addf %149, %152 : vector<16x1xf32>
    %154 = math.rsqrt %153 : vector<16x1xf32>
    %155 = vector.broadcast %154 : vector<16x1xf32> to vector<16x32xf32>
    %156 = arith.mulf %151, %155 : vector<16x32xf32>
    %157 = vector.broadcast %58 : vector<1x32xf32> to vector<16x32xf32>
    %158 = arith.mulf %156, %157 : vector<16x32xf32>
    %159 = vector.broadcast %59 : vector<1x32xf32> to vector<16x32xf32>
    %160 = arith.addf %158, %159 : vector<16x32xf32>
    %c1 = arith.constant 1 : index
    %c0_47 = arith.constant 0 : index
    %c0_48 = arith.constant 0 : index
    %161 = vector.load %arg3[%c1, %c0_47, %c0_48] : memref<2x32x192xbf16, #tpu.memory_space<vmem>>, vector<1x32x192xbf16>
    %162 = vector.shape_cast %161 : vector<1x32x192xbf16> to vector<32x192xbf16>
    %c1_49 = arith.constant 1 : index
    %c0_50 = arith.constant 0 : index
    %c0_51 = arith.constant 0 : index
    %163 = vector.load %arg4[%c1_49, %c0_50, %c0_51] : memref<2x64x32xbf16, #tpu.memory_space<vmem>>, vector<1x64x32xbf16>
    %164 = vector.shape_cast %163 : vector<1x64x32xbf16> to vector<64x32xbf16>
    %c1_52 = arith.constant 1 : index
    %c0_53 = arith.constant 0 : index
    %c0_54 = arith.constant 0 : index
    %165 = vector.load %arg5[%c1_52, %c0_53, %c0_54] : memref<2x8x128xf32, #tpu.memory_space<vmem>>, vector<1x8x128xf32>
    %166 = vector.shape_cast %165 : vector<1x8x128xf32> to vector<8x128xf32>
    %167 = vector.extract_strided_slice %162 {offsets = [0, 0], sizes = [32, 96], strides = [1, 1]} : vector<32x192xbf16> to vector<32x96xbf16>
    %168 = vector.extract_strided_slice %162 {offsets = [0, 96], sizes = [32, 32], strides = [1, 1]} : vector<32x192xbf16> to vector<32x32xbf16>
    %169 = vector.extract_strided_slice %162 {offsets = [0, 128], sizes = [32, 64], strides = [1, 1]} : vector<32x192xbf16> to vector<32x64xbf16>
    %170 = vector.extract_strided_slice %166 {offsets = [0, 0], sizes = [1, 96], strides = [1, 1]} : vector<8x128xf32> to vector<1x96xf32>
    %171 = vector.extract_strided_slice %166 {offsets = [1, 0], sizes = [1, 32], strides = [1, 1]} : vector<8x128xf32> to vector<1x32xf32>
    %172 = vector.extract_strided_slice %166 {offsets = [2, 0], sizes = [1, 32], strides = [1, 1]} : vector<8x128xf32> to vector<1x32xf32>
    %173 = vector.extract_strided_slice %166 {offsets = [3, 0], sizes = [1, 32], strides = [1, 1]} : vector<8x128xf32> to vector<1x32xf32>
    %174 = vector.extract_strided_slice %166 {offsets = [4, 0], sizes = [1, 64], strides = [1, 1]} : vector<8x128xf32> to vector<1x64xf32>
    %175 = vector.extract_strided_slice %166 {offsets = [5, 0], sizes = [1, 32], strides = [1, 1]} : vector<8x128xf32> to vector<1x32xf32>
    %176 = vector.extract_strided_slice %166 {offsets = [6, 0], sizes = [1, 32], strides = [1, 1]} : vector<8x128xf32> to vector<1x32xf32>
    %177 = vector.extract_strided_slice %166 {offsets = [7, 0], sizes = [1, 32], strides = [1, 1]} : vector<8x128xf32> to vector<1x32xf32>
    %178 = arith.truncf %160 : vector<16x32xf32> to vector<16x32xbf16>
    %cst_55 = arith.constant dense<0.000000e+00> : vector<16x96xf32>
    %179 = tpu.matmul %178, %167, %cst_55 {dimension_numbers = #tpu.dot_dimension_numbers<[1], [0], [0], [1], [0, 0, 1, 1], [], []>} : vector<16x32xbf16>, vector<32x96xbf16>, vector<16x96xf32> -> vector<16x96xf32>
    %180 = vector.broadcast %170 : vector<1x96xf32> to vector<16x96xf32>
    %181 = arith.addf %179, %180 : vector<16x96xf32>
    %182 = arith.truncf %181 : vector<16x96xf32> to vector<16x96xbf16>
    %183 = vector.extract_strided_slice %182 {offsets = [0, 0], sizes = [16, 32], strides = [1, 1]} : vector<16x96xbf16> to vector<16x32xbf16>
    %184 = vector.shape_cast %183 : vector<16x32xbf16> to vector<2x8x32xbf16>
    %185 = vector.extract_strided_slice %182 {offsets = [0, 32], sizes = [16, 32], strides = [1, 1]} : vector<16x96xbf16> to vector<16x32xbf16>
    %186 = vector.shape_cast %185 : vector<16x32xbf16> to vector<2x8x32xbf16>
    %187 = vector.extract_strided_slice %182 {offsets = [0, 64], sizes = [16, 32], strides = [1, 1]} : vector<16x96xbf16> to vector<16x32xbf16>
    %188 = vector.shape_cast %187 : vector<16x32xbf16> to vector<2x8x32xbf16>
    "tpu.trace_start"() <{level = 10 : i32, message = "bqd,bkd->bqk"}> : () -> ()
    %cst_56 = arith.constant dense<0.000000e+00> : vector<2x8x8xf32>
    %189 = tpu.matmul %184, %186, %cst_56 {dimension_numbers = #tpu.dot_dimension_numbers<[2], [2], [1], [1], [0, 0, 0, 1, 1, 1], [0], [0]>} : vector<2x8x32xbf16>, vector<2x8x32xbf16>, vector<2x8x8xf32> -> vector<2x8x8xf32>
    "tpu.trace_stop"() : () -> ()
    %cst_57 = arith.constant 0.176776692 : f32
    %190 = vector.broadcast %cst_57 : f32 to vector<2x8x8xf32>
    %191 = arith.mulf %189, %190 : vector<2x8x8xf32>
    %192 = vector.shape_cast %42 : vector<2x8xf32> to vector<2x1x8xf32>
    %193 = vector.broadcast %192 : vector<2x1x8xf32> to vector<2x8x8xf32>
    %194 = arith.addf %191, %193 : vector<2x8x8xf32>
    %cst_58 = arith.constant dense<0xFF800000> : vector<2x8xf32>
    %195 = vector.multi_reduction <maximumf>, %194, %cst_58 [2] : vector<2x8x8xf32> to vector<2x8xf32>
    %196 = vector.shape_cast %195 : vector<2x8xf32> to vector<2x8x1xf32>
    %197 = vector.broadcast %196 : vector<2x8x1xf32> to vector<2x8x8xf32>
    %198 = arith.subf %194, %197 : vector<2x8x8xf32>
    %199 = math.exp %198 : vector<2x8x8xf32>
    %cst_59 = arith.constant dense<0.000000e+00> : vector<2x8xf32>
    %200 = vector.multi_reduction <add>, %199, %cst_59 [2] : vector<2x8x8xf32> to vector<2x8xf32>
    %201 = vector.shape_cast %200 : vector<2x8xf32> to vector<2x8x1xf32>
    %202 = tpu.reciprocal %201 {approx = true} : vector<2x8x1xf32> -> vector<2x8x1xf32>
    %203 = vector.broadcast %202 : vector<2x8x1xf32> to vector<2x8x8xf32>
    %204 = arith.mulf %199, %203 : vector<2x8x8xf32>
    %205 = arith.truncf %204 : vector<2x8x8xf32> to vector<2x8x8xbf16>
    "tpu.trace_start"() <{level = 10 : i32, message = "bqk,bkd->bqd"}> : () -> ()
    %cst_60 = arith.constant dense<0.000000e+00> : vector<2x8x32xf32>
    %206 = tpu.matmul %205, %188, %cst_60 {dimension_numbers = #tpu.dot_dimension_numbers<[2], [1], [1], [2], [0, 0, 0, 1, 1, 2], [0], [0]>} : vector<2x8x8xbf16>, vector<2x8x32xbf16>, vector<2x8x32xf32> -> vector<2x8x32xf32>
    "tpu.trace_stop"() : () -> ()
    %207 = vector.shape_cast %206 : vector<2x8x32xf32> to vector<16x32xf32>
    %208 = arith.truncf %207 : vector<16x32xf32> to vector<16x32xbf16>
    %cst_61 = arith.constant dense<0.000000e+00> : vector<16x32xf32>
    %209 = tpu.matmul %208, %168, %cst_61 {dimension_numbers = #tpu.dot_dimension_numbers<[1], [0], [0], [1], [0, 0, 1, 1], [], []>} : vector<16x32xbf16>, vector<32x32xbf16>, vector<16x32xf32> -> vector<16x32xf32>
    %210 = arith.addf %160, %209 : vector<16x32xf32>
    %211 = vector.broadcast %171 : vector<1x32xf32> to vector<16x32xf32>
    %212 = arith.addf %210, %211 : vector<16x32xf32>
    %cst_62 = arith.constant dense<0.000000e+00> : vector<16xf32>
    %213 = vector.multi_reduction <add>, %212, %cst_62 [1] : vector<16x32xf32> to vector<16xf32>
    %214 = vector.shape_cast %213 : vector<16xf32> to vector<16x1xf32>
    %cst_63 = arith.constant 3.200000e+01 : f32
    %215 = vector.broadcast %cst_63 : f32 to vector<16x1xf32>
    %216 = arith.divf %214, %215 : vector<16x1xf32>
    %217 = vector.broadcast %216 : vector<16x1xf32> to vector<16x32xf32>
    %218 = arith.subf %212, %217 : vector<16x32xf32>
    %219 = arith.mulf %218, %218 : vector<16x32xf32>
    %cst_64 = arith.constant dense<0.000000e+00> : vector<16xf32>
    %220 = vector.multi_reduction <add>, %219, %cst_64 [1] : vector<16x32xf32> to vector<16xf32>
    %221 = vector.shape_cast %220 : vector<16xf32> to vector<16x1xf32>
    %cst_65 = arith.constant 3.200000e+01 : f32
    %222 = vector.broadcast %cst_65 : f32 to vector<16x1xf32>
    %223 = arith.divf %221, %222 : vector<16x1xf32>
    %224 = vector.broadcast %216 : vector<16x1xf32> to vector<16x32xf32>
    %225 = arith.subf %212, %224 : vector<16x32xf32>
    %cst_66 = arith.constant 9.99999996E-13 : f32
    %226 = vector.broadcast %cst_66 : f32 to vector<16x1xf32>
    %227 = arith.addf %223, %226 : vector<16x1xf32>
    %228 = math.rsqrt %227 : vector<16x1xf32>
    %229 = vector.broadcast %228 : vector<16x1xf32> to vector<16x32xf32>
    %230 = arith.mulf %225, %229 : vector<16x32xf32>
    %231 = vector.broadcast %172 : vector<1x32xf32> to vector<16x32xf32>
    %232 = arith.mulf %230, %231 : vector<16x32xf32>
    %233 = vector.broadcast %173 : vector<1x32xf32> to vector<16x32xf32>
    %234 = arith.addf %232, %233 : vector<16x32xf32>
    %235 = arith.truncf %234 : vector<16x32xf32> to vector<16x32xbf16>
    %cst_67 = arith.constant dense<0.000000e+00> : vector<16x64xf32>
    %236 = tpu.matmul %235, %169, %cst_67 {dimension_numbers = #tpu.dot_dimension_numbers<[1], [0], [0], [1], [0, 0, 1, 1], [], []>} : vector<16x32xbf16>, vector<32x64xbf16>, vector<16x64xf32> -> vector<16x64xf32>
    %237 = vector.broadcast %174 : vector<1x64xf32> to vector<16x64xf32>
    %238 = arith.addf %236, %237 : vector<16x64xf32>
    %239 = arith.mulf %238, %238 : vector<16x64xf32>
    %240 = arith.mulf %238, %239 : vector<16x64xf32>
    %cst_68 = arith.constant 4.471500e-02 : f32
    %241 = vector.broadcast %cst_68 : f32 to vector<16x64xf32>
    %242 = arith.mulf %241, %240 : vector<16x64xf32>
    %243 = arith.addf %238, %242 : vector<16x64xf32>
    %cst_69 = arith.constant 0.797884583 : f32
    %244 = vector.broadcast %cst_69 : f32 to vector<16x64xf32>
    %245 = arith.mulf %244, %243 : vector<16x64xf32>
    %246 = math.tanh %245 : vector<16x64xf32>
    %cst_70 = arith.constant 1.000000e+00 : f32
    %247 = vector.broadcast %cst_70 : f32 to vector<16x64xf32>
    %248 = arith.addf %247, %246 : vector<16x64xf32>
    %cst_71 = arith.constant 5.000000e-01 : f32
    %249 = vector.broadcast %cst_71 : f32 to vector<16x64xf32>
    %250 = arith.mulf %249, %248 : vector<16x64xf32>
    %251 = arith.mulf %238, %250 : vector<16x64xf32>
    %252 = arith.truncf %251 : vector<16x64xf32> to vector<16x64xbf16>
    %cst_72 = arith.constant dense<0.000000e+00> : vector<16x32xf32>
    %253 = tpu.matmul %252, %164, %cst_72 {dimension_numbers = #tpu.dot_dimension_numbers<[1], [0], [0], [1], [0, 0, 1, 1], [], []>} : vector<16x64xbf16>, vector<64x32xbf16>, vector<16x32xf32> -> vector<16x32xf32>
    %254 = arith.addf %234, %253 : vector<16x32xf32>
    %255 = vector.broadcast %175 : vector<1x32xf32> to vector<16x32xf32>
    %256 = arith.addf %254, %255 : vector<16x32xf32>
    %cst_73 = arith.constant dense<0.000000e+00> : vector<16xf32>
    %257 = vector.multi_reduction <add>, %256, %cst_73 [1] : vector<16x32xf32> to vector<16xf32>
    %258 = vector.shape_cast %257 : vector<16xf32> to vector<16x1xf32>
    %cst_74 = arith.constant 3.200000e+01 : f32
    %259 = vector.broadcast %cst_74 : f32 to vector<16x1xf32>
    %260 = arith.divf %258, %259 : vector<16x1xf32>
    %261 = vector.broadcast %260 : vector<16x1xf32> to vector<16x32xf32>
    %262 = arith.subf %256, %261 : vector<16x32xf32>
    %263 = arith.mulf %262, %262 : vector<16x32xf32>
    %cst_75 = arith.constant dense<0.000000e+00> : vector<16xf32>
    %264 = vector.multi_reduction <add>, %263, %cst_75 [1] : vector<16x32xf32> to vector<16xf32>
    %265 = vector.shape_cast %264 : vector<16xf32> to vector<16x1xf32>
    %cst_76 = arith.constant 3.200000e+01 : f32
    %266 = vector.broadcast %cst_76 : f32 to vector<16x1xf32>
    %267 = arith.divf %265, %266 : vector<16x1xf32>
    %268 = vector.broadcast %260 : vector<16x1xf32> to vector<16x32xf32>
    %269 = arith.subf %256, %268 : vector<16x32xf32>
    %cst_77 = arith.constant 9.99999996E-13 : f32
    %270 = vector.broadcast %cst_77 : f32 to vector<16x1xf32>
    %271 = arith.addf %267, %270 : vector<16x1xf32>
    %272 = math.rsqrt %271 : vector<16x1xf32>
    %273 = vector.broadcast %272 : vector<16x1xf32> to vector<16x32xf32>
    %274 = arith.mulf %269, %273 : vector<16x32xf32>
    %275 = vector.broadcast %176 : vector<1x32xf32> to vector<16x32xf32>
    %276 = arith.mulf %274, %275 : vector<16x32xf32>
    %277 = vector.broadcast %177 : vector<1x32xf32> to vector<16x32xf32>
    %278 = arith.addf %276, %277 : vector<16x32xf32>
    %279 = vector.shape_cast %278 : vector<16x32xf32> to vector<2x8x32xf32>
    %c74 = arith.constant 74 : index
    %c0_78 = arith.constant 0 : index
    %280 = vector.load %arg2[%c74, %c0_78] : memref<75x32xf32, #tpu.memory_space<vmem>>, vector<1x32xf32>
    %cst_79 = arith.constant 0.000000e+00 : f32
    %281 = vector.broadcast %cst_79 : f32 to vector<2x32xf32>
    %282 = vector.broadcast %280 : vector<1x32xf32> to vector<2x32xf32>
    %283 = arith.addf %281, %282 : vector<2x32xf32>
    %284 = vector.extract_strided_slice %279 {offsets = [0, 0, 0], sizes = [2, 1, 32], strides = [1, 1, 1]} : vector<2x8x32xf32> to vector<2x1x32xf32>
    %285 = vector.shape_cast %284 : vector<2x1x32xf32> to vector<2x32xf32>
    %c0_80 = arith.constant 0 : index
    %c0_81 = arith.constant 0 : index
    %c0_82 = arith.constant 0 : index
    %286 = vector.load %arg6[%c0_80, %c0_81, %c0_82] : memref<8x32x32xf32, #tpu.memory_space<vmem>>, vector<1x32x32xf32>
    %287 = vector.shape_cast %286 : vector<1x32x32xf32> to vector<32x32xf32>
    %cst_83 = arith.constant dense<0.000000e+00> : vector<2x32xf32>
    %288 = tpu.matmul %285, %287, %cst_83 {dimension_numbers = #tpu.dot_dimension_numbers<[1], [0], [0], [1], [0, 0, 1, 1], [], []>} : vector<2x32xf32>, vector<32x32xf32>, vector<2x32xf32> -> vector<2x32xf32>
    %289 = arith.addf %283, %288 : vector<2x32xf32>
    %290 = vector.extract_strided_slice %279 {offsets = [0, 1, 0], sizes = [2, 1, 32], strides = [1, 1, 1]} : vector<2x8x32xf32> to vector<2x1x32xf32>
    %291 = vector.shape_cast %290 : vector<2x1x32xf32> to vector<2x32xf32>
    %c1_84 = arith.constant 1 : index
    %c0_85 = arith.constant 0 : index
    %c0_86 = arith.constant 0 : index
    %292 = vector.load %arg6[%c1_84, %c0_85, %c0_86] : memref<8x32x32xf32, #tpu.memory_space<vmem>>, vector<1x32x32xf32>
    %293 = vector.shape_cast %292 : vector<1x32x32xf32> to vector<32x32xf32>
    %cst_87 = arith.constant dense<0.000000e+00> : vector<2x32xf32>
    %294 = tpu.matmul %291, %293, %cst_87 {dimension_numbers = #tpu.dot_dimension_numbers<[1], [0], [0], [1], [0, 0, 1, 1], [], []>} : vector<2x32xf32>, vector<32x32xf32>, vector<2x32xf32> -> vector<2x32xf32>
    %295 = arith.addf %289, %294 : vector<2x32xf32>
    %296 = vector.extract_strided_slice %279 {offsets = [0, 2, 0], sizes = [2, 1, 32], strides = [1, 1, 1]} : vector<2x8x32xf32> to vector<2x1x32xf32>
    %297 = vector.shape_cast %296 : vector<2x1x32xf32> to vector<2x32xf32>
    %c2 = arith.constant 2 : index
    %c0_88 = arith.constant 0 : index
    %c0_89 = arith.constant 0 : index
    %298 = vector.load %arg6[%c2, %c0_88, %c0_89] : memref<8x32x32xf32, #tpu.memory_space<vmem>>, vector<1x32x32xf32>
    %299 = vector.shape_cast %298 : vector<1x32x32xf32> to vector<32x32xf32>
    %cst_90 = arith.constant dense<0.000000e+00> : vector<2x32xf32>
    %300 = tpu.matmul %297, %299, %cst_90 {dimension_numbers = #tpu.dot_dimension_numbers<[1], [0], [0], [1], [0, 0, 1, 1], [], []>} : vector<2x32xf32>, vector<32x32xf32>, vector<2x32xf32> -> vector<2x32xf32>
    %301 = arith.addf %295, %300 : vector<2x32xf32>
    %302 = vector.extract_strided_slice %279 {offsets = [0, 3, 0], sizes = [2, 1, 32], strides = [1, 1, 1]} : vector<2x8x32xf32> to vector<2x1x32xf32>
    %303 = vector.shape_cast %302 : vector<2x1x32xf32> to vector<2x32xf32>
    %c3 = arith.constant 3 : index
    %c0_91 = arith.constant 0 : index
    %c0_92 = arith.constant 0 : index
    %304 = vector.load %arg6[%c3, %c0_91, %c0_92] : memref<8x32x32xf32, #tpu.memory_space<vmem>>, vector<1x32x32xf32>
    %305 = vector.shape_cast %304 : vector<1x32x32xf32> to vector<32x32xf32>
    %cst_93 = arith.constant dense<0.000000e+00> : vector<2x32xf32>
    %306 = tpu.matmul %303, %305, %cst_93 {dimension_numbers = #tpu.dot_dimension_numbers<[1], [0], [0], [1], [0, 0, 1, 1], [], []>} : vector<2x32xf32>, vector<32x32xf32>, vector<2x32xf32> -> vector<2x32xf32>
    %307 = arith.addf %301, %306 : vector<2x32xf32>
    %308 = vector.extract_strided_slice %279 {offsets = [0, 4, 0], sizes = [2, 1, 32], strides = [1, 1, 1]} : vector<2x8x32xf32> to vector<2x1x32xf32>
    %309 = vector.shape_cast %308 : vector<2x1x32xf32> to vector<2x32xf32>
    %c4 = arith.constant 4 : index
    %c0_94 = arith.constant 0 : index
    %c0_95 = arith.constant 0 : index
    %310 = vector.load %arg6[%c4, %c0_94, %c0_95] : memref<8x32x32xf32, #tpu.memory_space<vmem>>, vector<1x32x32xf32>
    %311 = vector.shape_cast %310 : vector<1x32x32xf32> to vector<32x32xf32>
    %cst_96 = arith.constant dense<0.000000e+00> : vector<2x32xf32>
    %312 = tpu.matmul %309, %311, %cst_96 {dimension_numbers = #tpu.dot_dimension_numbers<[1], [0], [0], [1], [0, 0, 1, 1], [], []>} : vector<2x32xf32>, vector<32x32xf32>, vector<2x32xf32> -> vector<2x32xf32>
    %313 = arith.addf %307, %312 : vector<2x32xf32>
    %314 = vector.extract_strided_slice %279 {offsets = [0, 5, 0], sizes = [2, 1, 32], strides = [1, 1, 1]} : vector<2x8x32xf32> to vector<2x1x32xf32>
    %315 = vector.shape_cast %314 : vector<2x1x32xf32> to vector<2x32xf32>
    %c5 = arith.constant 5 : index
    %c0_97 = arith.constant 0 : index
    %c0_98 = arith.constant 0 : index
    %316 = vector.load %arg6[%c5, %c0_97, %c0_98] : memref<8x32x32xf32, #tpu.memory_space<vmem>>, vector<1x32x32xf32>
    %317 = vector.shape_cast %316 : vector<1x32x32xf32> to vector<32x32xf32>
    %cst_99 = arith.constant dense<0.000000e+00> : vector<2x32xf32>
    %318 = tpu.matmul %315, %317, %cst_99 {dimension_numbers = #tpu.dot_dimension_numbers<[1], [0], [0], [1], [0, 0, 1, 1], [], []>} : vector<2x32xf32>, vector<32x32xf32>, vector<2x32xf32> -> vector<2x32xf32>
    %319 = arith.addf %313, %318 : vector<2x32xf32>
    %320 = vector.extract_strided_slice %279 {offsets = [0, 6, 0], sizes = [2, 1, 32], strides = [1, 1, 1]} : vector<2x8x32xf32> to vector<2x1x32xf32>
    %321 = vector.shape_cast %320 : vector<2x1x32xf32> to vector<2x32xf32>
    %c6 = arith.constant 6 : index
    %c0_100 = arith.constant 0 : index
    %c0_101 = arith.constant 0 : index
    %322 = vector.load %arg6[%c6, %c0_100, %c0_101] : memref<8x32x32xf32, #tpu.memory_space<vmem>>, vector<1x32x32xf32>
    %323 = vector.shape_cast %322 : vector<1x32x32xf32> to vector<32x32xf32>
    %cst_102 = arith.constant dense<0.000000e+00> : vector<2x32xf32>
    %324 = tpu.matmul %321, %323, %cst_102 {dimension_numbers = #tpu.dot_dimension_numbers<[1], [0], [0], [1], [0, 0, 1, 1], [], []>} : vector<2x32xf32>, vector<32x32xf32>, vector<2x32xf32> -> vector<2x32xf32>
    %325 = arith.addf %319, %324 : vector<2x32xf32>
    %326 = vector.extract_strided_slice %279 {offsets = [0, 7, 0], sizes = [2, 1, 32], strides = [1, 1, 1]} : vector<2x8x32xf32> to vector<2x1x32xf32>
    %327 = vector.shape_cast %326 : vector<2x1x32xf32> to vector<2x32xf32>
    %c7 = arith.constant 7 : index
    %c0_103 = arith.constant 0 : index
    %c0_104 = arith.constant 0 : index
    %328 = vector.load %arg6[%c7, %c0_103, %c0_104] : memref<8x32x32xf32, #tpu.memory_space<vmem>>, vector<1x32x32xf32>
    %329 = vector.shape_cast %328 : vector<1x32x32xf32> to vector<32x32xf32>
    %cst_105 = arith.constant dense<0.000000e+00> : vector<2x32xf32>
    %330 = tpu.matmul %327, %329, %cst_105 {dimension_numbers = #tpu.dot_dimension_numbers<[1], [0], [0], [1], [0, 0, 1, 1], [], []>} : vector<2x32xf32>, vector<32x32xf32>, vector<2x32xf32> -> vector<2x32xf32>
    %331 = arith.addf %325, %330 : vector<2x32xf32>
    %c0_106 = arith.constant 0 : index
    %c0_107 = arith.constant 0 : index
    %332 = vector.load %arg7[%c0_106, %c0_107] : memref<2x32xf32, #tpu.memory_space<vmem>>, vector<2x32xf32>
    tpu.vector_store %arg7[%c0_106, %c0_107], %331 {strides = array<i32>} : memref<2x32xf32, #tpu.memory_space<vmem>>, vector<2x32xf32>,
    return
  }
}

</mosaic_0001>

<bundles_post_ra>
// kernel: tpu_custom_call.1
= control target key start
LH: loop header
LB: loop body
LE: loop exit
PB: predicated region body
PF: predicated region fallthrough
CT: control target
= control target key end

     0   :  { %12 = vsyncpa [#allocation3], 0  ;;  %s3155_s0 = inlined_call_operand.vmem [shape: s32[16,1], index: 0, kind: input, shape index: {}]   ;;  %s3156_s1 = inlined_call_operand.vmem [shape: f32[2,8], index: 1, kind: input, shape index: {}]   ;;  %s3157_s2 = inlined_call_operand.vmem [shape: f32[75,32], index: 2, kind: input, shape index: {}]   ;;  %s3158_s3 = inlined_call_operand.vmem [shape: bf16[2,32,192], index: 3, kind: input, shape index: {}]   ;;  %s3159_s4 = inlined_call_operand.vmem [shape: bf16[2,64,32], index: 4, kind: input, shape index: {}]   ;;  %s3160_s5 = inlined_call_operand.vmem [shape: f32[2,8,128], index: 5, kind: input, shape index: {}]   ;;  %s3161_s6 = inlined_call_operand.hbm [shape: f32[8,32,32], index: 6, kind: input, shape index: {}]   ;;  %s3162_s7 = inlined_call_operand.hbm [shape: f32[2,32], index: 7, kind: output, shape index: {}]  }
   0x1   :  { %13 = vsyncpa [#allocation4], 0  ;;  %s2672_s24 = smov [#allocation2]   ;;  %s2624_s28 = scalar_lea.hbm %s3161_s6, 4096 }
   0x2   :  { %s31_s25 = sshll.u32 %s2672_s24, 4  ;;  %p2625_p0 = scmp.ne.s32.totalorder %s3161_s6, %s2624_s28  ;;  %s32_s25 = int_to_ptr.vmem [resolvable:$true] %s31_s25 }
   0x3   :  { %p2628_p1 = scmp.lt.u32.totalorder %s2624_s28, %s3161_s6 }
   0x5   :  { %p2630_p2 = pnand %p2628_p1, %p2625_p0 }
   0x7   :  { %2633 = shalt.err (!%p2630_p2)
}
   0x8   :  { %s2634_s10 = scalar_lea.vmem %s32_s25, 4096  ;;  %p2639_p4 = scmp.lt.s32.totalorder %s32_s25, %s32_s25 }
   0x9   :  { %p2635_p3 = scmp.ne.s32.totalorder %s32_s25, %s2634_s10  ;;  %p2640_p5 = scmp.lt.s32.totalorder %s2634_s10, %s2634_s10 }
   0xb   :  { %p2641_p6 = por %p2640_p5, %p2639_p4 }
   0xd   :  { %p2642_p7 = pnand %p2641_p6, %p2635_p3 }
   0xf   :  { %2645 = shalt.err (!%p2642_p7)
}
  0x10   :  { %s2673_s11 = smov 128   ;;  %s2674_s12 = smov 8  }
  0x11   :  { %37 = dma.hbm_to_vmem [thread:$0]  %s3161_s6, 4096, %s32_s25, [#allocation3], %s2673_s11, %s2673_s11, %s2674_s12  }
  0x12   :  { %2668 = dma.done.wait [#allocation3], 4096  }
  0x13   :  { %2669 = vsyncadd [#allocation3], 4294963200  ;;  %v2675_v0 = vmov 0   ;;  %v42_v1 = vld [vmem:[%s3155_s0] sm:$0xff]  ;;  %v59_v3 = vld [vmem:[%s3157_s2 + $0x8] sm:$0xff]  ;;  %v2676_v10 = vmov 0.0   ;;  %v44_v16 = vlaneseq }
  0x14   :  { %2559 = vset.pattern.permute.xlu0 %v2675_v0  ;;  %v58_v2 = vld [vmem:[%s3157_s2] sm:$0xff]  ;;  %v60_v4 = vld [vmem:[%s3157_s2 + $0x10] sm:$0xff]  ;;  %v61_v5 = vld [vmem:[%s3157_s2 + $0x18] sm:$0xff]  ;;  %2261 = vmatprep.subr.bf16.mxu1 %v2676_v10  ;;  %vm67_vm0 = vcmask 523264   ;;  %vm153_vm3 = vcmask 261120   ;;  %vm2677_vm4 = vmmov 0  }
  0x15   :  { %47 = vperm.xlu0 %2559, %v42_v1   ;;  %v43_v6 = vld [vmem:[%s3155_s0 + $0x8] sm:$0xff]  ;;  %v2469_v7 = vpack.c.bf16 %v59_v3, %v58_v2  ;;  %v2473_v8 = vpack.c.bf16 %v61_v5, %v60_v4  ;;  %v62_v9 = vld [vmem:[%s3157_s2 + $0x20] sm:$0xff]  ;;  %v64_v12 = vld [vmem:[%s3157_s2 + $0x30] sm:$0xff]  ;;  %v45_v17 = vand.u32 127, %v44_v16  ;;  %2265 = vmatprep.mubr.msk.bf16.mxu1 %vm2677_vm4, %v2676_v10  ;;  %v2814_v58 = vshrl.u32 %v44_v16, 7  ;;  %s2678_s22 = smov 96  }
  0x16   :  { %v63_v11 = vld [vmem:[%s3157_s2 + $0x28] sm:$0xff]  ;;  %v65_v14 = vld [vmem:[%s3157_s2 + $0x38] sm:$0xff]  ;;  %v66_v22 = vld [vmem:[%s3157_s2 + $0x40] sm:$0xff]  ;;  %vm409_vm5 = vcmask 64512   ;;  %vm439_vm6 = vcmask 1043456   ;;  %s2681_s24 = smov 32  }
  0x17   :  { %2470 = vmatprep.subr.bf16.mxu0 %v2469_v7  ;;  %v2477_v13 = vpack.c.bf16 %v63_v11, %v62_v9  ;;  %v2481_v15 = vpack.c.bf16 %v65_v14, %v64_v12  ;;  %v2783_v39 = vld [vmem:[%s3158_s3] ss:$8 sps:$4 sm:$0xff]   ;;  %v2789_v40 = vld [vmem:[%s3158_s3 + $0x10] ss:$8 sps:$4 sm:$0xff]   ;;  %v2817_v59 = vsub.s32 0, %v2814_v58  ;;  %vm1421_vm7 = vcmask 1041409  }
  0x18   :  { %2472 = vmatpush3.bf16.msra.mxu0 %v2469_v7  ;;  %2262 = vmatpush3.bf16.msra.mxu1 %v2783_v39  ;;  %v2083_v49 = vld [vmem:[%s3157_s2 + $0x48] ss:$0 sm:$0xff]  ;;  %v2084_v53 = vld [vmem:[%s3157_s2 + $0x49] ss:$0 sm:$0xff]  ;;  %v2822_v60 = vld [vmem:[%s3160_s5] sm:$0xff]  ;;  %s2683_s28 = smov [#allocation5]  }
  0x19   :  { %50 = vperm.xlu0 %2559, %v43_v6   ;;  %2474 = vmatprep.subr.bf16.mxu0 %v2473_v8  ;;  %v213_v61 = vrot.slane %v2822_v60, %v2817_v59  ;;  %v2679_v11 = vmov 1966171168   ;;  %s2070_s29 = sshll.u32 %s2683_s28, 4  ;;  %vm2062_vm8 = vcmask 254976   ;;  %s2071_s29 = int_to_ptr.vmem [resolvable:$true] %s2070_s29 }
  0x1a   :  { %2263 = vmatprep.subr.bf16.mxu1 %v2676_v10  ;;  %v376_v12 = vunpack.c.l.s4 %v2679_v11  ;;  %s2646_s30 = scalar_lea.vmem %s2071_s29, 32  ;;  %p2651_p9 = scmp.lt.s32.totalorder %s2071_s29, %s2071_s29 }
  0x1b   :  { %p2647_p8 = scmp.ne.s32.totalorder %s2071_s29, %s2646_s30  ;;  %p2652_p10 = scmp.lt.s32.totalorder %s2646_s30, %s2646_s30 }
  0x1c   :  { %2476 = vmatpush3.bf16.msra.mxu0 %v2473_v8  ;;  %2264 = vmatpush3.bf16.msra.mxu1 %v2789_v40 }
  0x1d   :  { %2478 = vmatprep.subr.bf16.mxu0 %v2477_v13  ;;  %2269 = vmatprep.subr.bf16.mxu1 %v2676_v10  ;;  %p2653_p11 = por %p2652_p10, %p2651_p9 }
  0x1f   :  { %p2654_p12 = pnand %p2653_p11, %p2647_p8 }
  0x20   :  { %2480 = vmatpush3.bf16.msra.mxu0 %v2477_v13  ;;  %v193_v13 = vld [vmem:[%s3156_s1] sm:$0x3]  ;;  %s2680_s1 = smov 64  }
  0x21   :  { %2482 = vmatprep.subr.bf16.mxu0 %v2481_v15  ;;  %v2085_v14 = vadd.f32 -1.0, %v193_v13 }
  0x23   :  { %v195_v16 = vmul.f32 1e+09, %v2085_v14 }
  0x24   :  { %2484 = vmatpush3.bf16.msra.mxu0 %v2481_v15  ;;  %v377_v15 = vunpack.c.0.s8 %v376_v12 }
  0x25   :  { %2275 = vmatprep.subr.bf16.mxu0 %v2676_v10 }
  0x94   :  { %v48_v18 = vpop.permute.xlu0 %47 }
  0x95   :  { %vm52_vm1 = vcmp.eq.s32.totalorder %v48_v18, %v45_v17 }
  0x96   :  { %v2079_v19 = vsel %vm52_vm1, 1.0, %v2676_v10 }
  0x97   :  { %2258 = vmatprep.mubr.msk.f32.mxu0 %vm67_vm0, %v2079_v19 }
  0x98   :  { %v51_v20 = vpop.permute.xlu0 %50 }
  0x99   :  { %vm53_vm2 = vcmp.eq.s32.totalorder %v51_v20, %v45_v17  ;;  %v380_v17 = vsub.s32 %v377_v15, %v2814_v58  ;;  %v586_v15 = vsub.s32 1, %v2814_v58 }
  0x9a   :  { %v2080_v21 = vsel %vm53_vm2, 1.0, %v2676_v10 }
  0x9b   :  { %2259 = vmatmul.mubr.msk.f32.vlgmr.msra.gmra.mrb[0].mxu0 %vm67_vm0, %v2080_v21  ;;  %v381_v18 = vrot.slane %v195_v16, %v380_v17  ;;  %v587_v16 = vrot.slane %v2822_v60, %v586_v15 }
  0x9c   :  { %2277 = vmatprep.mubr.msk.bf16.mxu0 %vm2677_vm4, %v2676_v10 }
  0x9d   :  { %v389_v19 = vrot.slane %v381_v18, %v380_v17  ;;  %v382_v20 = vcombine.high %v381_v18, %v381_v18 }
  0x9f   :  { %v2847_v21 = vrot.slane %v389_v19, %v2817_v59 }
 0x16e   :  { %v2260_v23 = vpop.f32.mrb[0].mxu0 }
 0x16f   :  { %v140_v24 = vpop.f32.mrb[1].mxu0  ;;  %v150_v26 = vadd.f32 %v2260_v23, %v66_v22 }
 0x170   :  { %v149_v25 = vadd.f32 %v140_v24, %v66_v22  ;;  %v396_v22 = vrot.slane %v382_v20, %v380_v17 }
 0x171   :  { %v157_v28 = vsel %vm153_vm3, %v150_v26, 0.0 }
 0x172   :  { %v154_v27 = vsel %vm153_vm3, %v149_v25, 0.0 }
 0x173   :  { %155 = vadd.xlane.f32.xlu1 %v154_v27 }
 0x177   :  { %158 = vadd.xlane.f32.xlu1 %v157_v28 }
 0x200   :  { %v156_v29 = vpop.xlane.xlu1 %155 }
 0x201   :  { %v161_v30 = vmul.f32 0.03125, %v156_v29  ;;  %v2851_v29 = vrot.slane %v396_v22, %v2817_v59 }
 0x203   :  { %v163_v31 = vsub.f32 %v149_v25, %v161_v30 }
 0x204   :  { %v159_v32 = vpop.xlane.xlu1 %158 }
 0x205   :  { %v162_v33 = vmul.f32 0.03125, %v159_v32  ;;  %v165_v34 = vmul.f32 %v163_v31, %v163_v31 }
 0x207   :  { %v164_v35 = vsub.f32 %v150_v26, %v162_v33  ;;  %v167_v36 = vsel %vm153_vm3, %v165_v34, 0.0 }
 0x208   :  { %168 = vadd.xlane.f32.xlu0 %v167_v36 }
 0x209   :  { %v166_v37 = vmul.f32 %v164_v35, %v164_v35 }
 0x20b   :  { %v170_v38 = vsel %vm153_vm3, %v166_v37, 0.0 }
 0x20c   :  { %171 = vadd.xlane.f32.xlu1 %v170_v38 }
 0x295   :  { %v169_v41 = vpop.xlane.xlu0 %168 }
 0x296   :  { %v173_v42 = vmul.f32 0.03125, %v169_v41 }
 0x298   :  { %v175_v43 = vadd.f32 1e-12, %v173_v42 }
 0x299   :  { %v172_v44 = vpop.xlane.xlu1 %171 }
 0x29a   :  { %2580 = vrsqrt.f32 %v175_v43  ;;  %v174_v45 = vmul.f32 0.03125, %v172_v44 }
 0x29c   :  { %v176_v46 = vadd.f32 1e-12, %v174_v45 }
 0x29e   :  { %2582 = vrsqrt.f32 %v176_v46 }
 0x2a4   :  { %v2581_v47 = vpop.eup %2580 }
 0x2a5   :  { %v179_v48 = vmul.f32 %v2581_v47, %v163_v31 }
 0x2a7   :  { %v185_v52 = vmul.f32 %v2083_v49, %v179_v48 }
 0x2a8   :  { %v2583_v50 = vpop.eup %2582 }
 0x2a9   :  { %v180_v51 = vmul.f32 %v2583_v50, %v164_v35  ;;  %v2804_v55 = vadd.f32 %v2084_v53, %v185_v52 }
 0x2ab   :  { %v186_v54 = vmul.f32 %v2083_v49, %v180_v51 }
 0x2ad   :  { %v2806_v56 = vadd.f32 %v2084_v53, %v186_v54 }
 0x2af   :  { %v209_v57 = vpack.c.bf16 %v2806_v56, %v2804_v55 }
 0x2b1   :  { %2266 = vmatmul.mubr.msk.bf16.vlgmr.msra.gmra.mrb[0].mxu1 %vm153_vm3, %v209_v57 }
 0x2b2   :  { %2271 = vmatprep.mubr.msk.bf16.mxu1 %vm2677_vm4, %v2676_v10 }
 0x384   :  { %v263_v62 = vpop.f32.mrb[0].mxu1 }
 0x385   :  { %v264_v63 = vadd.f32 %v263_v62, %v213_v61  ;;  %v2267_v0 = vpop.f32.mrb[1].mxu1 }
 0x386   :  { %v266_v1 = vpop.f32.mrb[2].mxu1 }
 0x387   :  { %v2826_v2 = vpack.c.bf16 %v264_v63, %v264_v63  ;;  %v267_v3 = vadd.f32 %v266_v1, %v213_v61  ;;  %v2268_v4 = vpop.f32.mrb[3].mxu1 }
 0x389   :  { %276 = vrot.lane.b32.xlu1 %v2826_v2, %s2678_s22  ;;  %v2145_v5 = vpack.c.bf16 %v267_v3, %v267_v3  ;;  %v2565_v3 = vld [vmem:[%s3158_s3 + $0x14] ss:$8 sps:$4 sm:$0xff]  }
 0x38d   :  { %324 = vrot.lane.b32.xlu1 %v2145_v5, %s2678_s22 }
 0x3fb   :  { %v277_v6 = vpop.permute.xlu1 %276 }
 0x3fc   :  { %v282_v7 = vsel %vm153_vm3, %v277_v6, 0 }
 0x3fd   :  { %2270 = vmatpush3.bf16.xpose.msra.mxu1 %v282_v7 }
 0x3fe   :  { %2281 = vmatprep.subr.bf16.mxu1 %v2676_v10 }
 0x3ff   :  { %v325_v8 = vpop.permute.xlu1 %324 }
 0x400   :  { %v330_v9 = vsel %vm153_vm3, %v325_v8, 0 }
 0x401   :  { %2276 = vmatpush3.bf16.xpose.msra.mxu0 %v330_v9 }
 0x402   :  { %2287 = vmatprep.subr.bf16.mxu0 %v2676_v10 }
 0x404   :  { %2272 = vmatmul.mubr.msk.bf16.vlgmr.msra.gmra.mrb[4].mxu1 %vm153_vm3, %v2826_v2 }
 0x405   :  { %2283 = vmatprep.mubr.msk.bf16.mxu1 %vm2677_vm4, %v2676_v10 }
 0x408   :  { %2278 = vmatmul.mubr.msk.bf16.vlgmr.msra.gmra.mrb[4].mxu0 %vm153_vm3, %v2145_v5 }
 0x409   :  { %2289 = vmatprep.mubr.msk.bf16.mxu0 %vm2677_vm4, %v2676_v10 }
 0x4d7   :  { %v318_v23 = vpop.f32.mrb[4].mxu1 }
 0x4d8   :  { %v372_v24 = vmul.f32 0.17677669, %v318_v23  ;;  %v2273_v25 = vpop.f32.mrb[5].mxu1 }
 0x4d9   :  { %v321_v26 = vpop.f32.mrb[6].mxu1 }
 0x4da   :  { %v2274_v27 = vpop.f32.mrb[7].mxu1  ;;  %v407_v28 = vadd.f32 %v2847_v21, %v372_v24 }
 0x4db   :  { %v366_v30 = vpop.f32.mrb[4].mxu0 }
 0x4dc   :  { %v373_v31 = vmul.f32 0.17677669, %v366_v30  ;;  %v2279_v32 = vpop.f32.mrb[5].mxu0  ;;  %v410_v33 = vsel %vm409_vm5, %v407_v28, -inf }
 0x4dd   :  { %v369_v34 = vpop.f32.mrb[6].mxu0  ;;  %411 = vmax.xlane.f32.xlu1 %v410_v33 }
 0x4de   :  { %v2280_v35 = vpop.f32.mrb[7].mxu0  ;;  %v408_v36 = vadd.f32 %v2851_v29, %v373_v31 }
 0x4e0   :  { %v413_v37 = vsel %vm409_vm5, %v408_v36, -inf }
 0x4e1   :  { %414 = vmax.xlane.f32.xlu0 %v413_v37 }
 0x4ee   :  { %483 = vrot.lane.b32.xlu1 %v2145_v5, %s2680_s1 }
 0x56a   :  { %v412_v38 = vpop.xlane.xlu1 %411 }
 0x56b   :  { %v416_v41 = vsub.f32 %v407_v28, %v412_v38 }
 0x56d   :  { %v418_v42 = vmul.f32 1.442695, %v416_v41 }
 0x56e   :  { %v415_v43 = vpop.xlane.xlu0 %414  ;;  %v484_v44 = vpop.permute.xlu1 %483 }
 0x56f   :  { %2584 = vpow2.f32 %v418_v42  ;;  %v417_v45 = vsub.f32 %v408_v36, %v415_v43  ;;  %v489_v46 = vsel %vm439_vm6, %v484_v44, 0 }
 0x570   :  { %2288 = vmatpush3.bf16.msra.mxu0 %v489_v46 }
 0x571   :  { %v420_v47 = vmul.f32 1.442695, %v417_v45  ;;  %2301 = vmatprep.subr.bf16.mxu0 %v2676_v10  ;;  %v618_v45 = vsub.s32 2, %v2814_v58 }
 0x573   :  { %2586 = vpow2.f32 %v420_v47  ;;  %v619_v47 = vrot.slane %v2822_v60, %v618_v45 }
 0x579   :  { %v2585_v48 = vpop.eup %2584 }
 0x57a   :  { %v422_v49 = vsel %vm409_vm5, %v2585_v48, 0.0 }
 0x57b   :  { %423 = vadd.xlane.f32.xlu0 %v422_v49  ;;  %v624_v49 = vsub.s32 3, %v2814_v58 }
 0x57d   :  { %v2587_v50 = vpop.eup %2586 }
 0x57e   :  { %v425_v51 = vsel %vm409_vm5, %v2587_v50, 0.0 }
 0x57f   :  { %426 = vadd.xlane.f32.xlu0 %v425_v51 }
 0x595   :  { %434 = vrot.lane.b32.xlu0 %v2826_v2, %s2680_s1 }
 0x599   :  { %532 = vrot.lane.b32.xlu0 %v2783_v39, %s2681_s24  ;;  %v2562_v39 = vld [vmem:[%s3158_s3 + $0x4] ss:$8 sps:$4 sm:$0xff]  }
 0x59d   :  { %534 = vrot.lane.b32.xlu0 %v2789_v40, %s2681_s24 }
 0x608   :  { %v424_v52 = vpop.xlane.xlu0 %423 }
 0x609   :  { %2588 = vrcp.f32 %v424_v52 }
 0x60c   :  { %v427_v53 = vpop.xlane.xlu0 %426 }
 0x60d   :  { %2590 = vrcp.f32 %v427_v53  ;;  %v625_v53 = vrot.slane %v2822_v60, %v624_v49 }
 0x610   :  { %v435_v54 = vpop.permute.xlu0 %434 }
 0x611   :  { %v441_v57 = vsel %vm439_vm6, %v435_v54, 0 }
 0x612   :  { %2282 = vmatpush3.bf16.msra.mxu1 %v441_v57 }
 0x613   :  { %v2589_v61 = vpop.eup %2588  ;;  %2293 = vmatprep.subr.bf16.mxu1 %v2676_v10 }
 0x614   :  { %v430_v62 = vmul.f32 %v2589_v61, %v2585_v48  ;;  %v533_v0 = vpop.permute.xlu0 %532 }
 0x616   :  { %v432_v63 = vpack.c.bf16 %v430_v62, %v430_v62 }
 0x617   :  { %v2591_v1 = vpop.eup %2590 }
 0x618   :  { %v431_v2 = vmul.f32 %v2591_v1, %v2587_v50  ;;  %2284 = vmatmul.mubr.msk.bf16.vlgmr.msra.gmra.mrb[8].mxu1 %vm409_vm5, %v432_v63  ;;  %v535_v4 = vpop.permute.xlu0 %534  ;;  %v2566_v63 = vld [vmem:[%s3159_s4] sm:$0xff]   ;;  %v2568_v1 = vld [vmem:[%s3159_s4 + $0x10] sm:$0xff]  }
 0x619   :  { %2294 = vmatpush3.bf16.msra.mxu1 %v533_v0  ;;  %2297 = vmatprep.mubr.msk.bf16.mxu1 %vm2677_vm4, %v2676_v10  ;;  %v2567_v0 = vld [vmem:[%s3159_s4 + $0x8] sm:$0xff]  }
 0x61a   :  { %v433_v40 = vpack.c.bf16 %v431_v2, %v431_v2  ;;  %2295 = vmatprep.subr.bf16.mxu1 %v2676_v10  ;;  %v2569_v2 = vld [vmem:[%s3159_s4 + $0x18] sm:$0xff]  }
 0x61c   :  { %2290 = vmatmul.mubr.msk.bf16.vlgmr.msra.gmra.mrb[8].mxu0 %vm409_vm5, %v433_v40 }
 0x61d   :  { %2302 = vmatpush3.bf16.msra.mxu0 %v2562_v39  ;;  %2305 = vmatprep.mubr.msk.bf16.mxu0 %vm2677_vm4, %v2676_v10  ;;  %v631_v39 = vsub.s32 4, %v2814_v58 }
 0x61e   :  { %2303 = vmatprep.subr.bf16.mxu0 %v2676_v10  ;;  %2296 = vmatpush3.bf16.msra.mxu1 %v535_v4 }
 0x61f   :  { %2335 = vmatprep.subr.bf16.mxu1 %v2676_v10  ;;  %v632_v40 = vrot.slane %v2822_v60, %v631_v39 }
 0x621   :  { %2304 = vmatpush3.bf16.msra.mxu0 %v2565_v3 }
 0x622   :  { %2309 = vmatprep.subr.bf16.mxu0 %v2676_v10 }
 0x6eb   :  { %v477_v5 = vpop.f32.mrb[8].mxu1 }
 0x6ec   :  { %v2285_v6 = vpop.f32.mrb[9].mxu1 }
 0x6ed   :  { %v480_v7 = vpop.f32.mrb[10].mxu1 }
 0x6ee   :  { %v2286_v8 = vpop.f32.mrb[11].mxu1 }
 0x6ef   :  { %v525_v9 = vpop.f32.mrb[8].mxu0 }
 0x6f0   :  { %v531_v11 = vpack.c.bf16 %v525_v9, %v477_v5  ;;  %v2291_v12 = vpop.f32.mrb[9].mxu0 }
 0x6f1   :  { %v528_v13 = vpop.f32.mrb[10].mxu0 }
 0x6f2   :  { %v2292_v14 = vpop.f32.mrb[11].mxu0  ;;  %2298 = vmatmul.mubr.msk.bf16.vlgmr.msra.gmra.mrb[12].mxu1 %vm153_vm3, %v531_v11 }
 0x6f3   :  { %2337 = vmatprep.mubr.msk.bf16.mxu1 %vm2677_vm4, %v2676_v10 }
 0x7c5   :  { %v575_v17 = vpop.f32.mrb[12].mxu1 }
 0x7c6   :  { %v582_v18 = vadd.f32 %v575_v17, %v2804_v55  ;;  %v2299_v19 = vpop.f32.mrb[13].mxu1 }
 0x7c7   :  { %v578_v20 = vpop.f32.mrb[14].mxu1 }
 0x7c8   :  { %v583_v22 = vadd.f32 %v578_v20, %v2806_v56  ;;  %v2300_v23 = vpop.f32.mrb[15].mxu1  ;;  %v588_v24 = vadd.f32 %v587_v16, %v582_v18 }
 0x7ca   :  { %v590_v25 = vsel %vm153_vm3, %v588_v24, 0.0  ;;  %v589_v26 = vadd.f32 %v587_v16, %v583_v22 }
 0x7cb   :  { %591 = vadd.xlane.f32.xlu0 %v590_v25 }
 0x7cc   :  { %v593_v27 = vsel %vm153_vm3, %v589_v26, 0.0 }
 0x7cd   :  { %594 = vadd.xlane.f32.xlu1 %v593_v27 }
 0x858   :  { %v592_v28 = vpop.xlane.xlu0 %591 }
 0x859   :  { %v596_v30 = vmul.f32 0.03125, %v592_v28 }
 0x85a   :  { %v595_v31 = vpop.xlane.xlu1 %594 }
 0x85b   :  { %v598_v32 = vsub.f32 %v588_v24, %v596_v30  ;;  %v597_v33 = vmul.f32 0.03125, %v595_v31 }
 0x85d   :  { %v599_v34 = vsub.f32 %v589_v26, %v597_v33  ;;  %v600_v55 = vmul.f32 %v598_v32, %v598_v32 }
 0x85f   :  { %v602_v35 = vsel %vm153_vm3, %v600_v55, 0.0  ;;  %v601_v36 = vmul.f32 %v599_v34, %v599_v34 }
 0x860   :  { %603 = vadd.xlane.f32.xlu0 %v602_v35 }
 0x861   :  { %v605_v56 = vsel %vm153_vm3, %v601_v36, 0.0 }
 0x864   :  { %606 = vadd.xlane.f32.xlu0 %v605_v56 }
 0x8ed   :  { %v604_v37 = vpop.xlane.xlu0 %603 }
 0x8ee   :  { %v608_v38 = vmul.f32 0.03125, %v604_v37 }
 0x8f0   :  { %v610_v41 = vadd.f32 1e-12, %v608_v38 }
 0x8f1   :  { %v607_v42 = vpop.xlane.xlu0 %606 }
 0x8f2   :  { %2592 = vrsqrt.f32 %v610_v41  ;;  %v609_v43 = vmul.f32 0.03125, %v607_v42 }
 0x8f4   :  { %v611_v44 = vadd.f32 1e-12, %v609_v43 }
 0x8f6   :  { %2594 = vrsqrt.f32 %v611_v44 }
 0x8fc   :  { %v2593_v46 = vpop.eup %2592 }
 0x8fd   :  { %v614_v48 = vmul.f32 %v2593_v46, %v598_v32  ;;  %v776_v32 = vsub.s32 5, %v2814_v58 }
 0x8ff   :  { %v620_v51 = vmul.f32 %v619_v47, %v614_v48  ;;  %v777_v33 = vrot.slane %v2822_v60, %v776_v32 }
 0x900   :  { %v2595_v50 = vpop.eup %2594 }
 0x901   :  { %v615_v52 = vmul.f32 %v2595_v50, %v599_v34  ;;  %v626_v57 = vadd.f32 %v625_v53, %v620_v51 }
 0x903   :  { %v621_v54 = vmul.f32 %v619_v47, %v615_v52 }
 0x905   :  { %v627_v61 = vadd.f32 %v625_v53, %v621_v54 }
 0x907   :  { %v628_v62 = vpack.c.bf16 %v627_v61, %v626_v57 }
 0x909   :  { %2306 = vmatmul.mubr.msk.bf16.vlgmr.msra.gmra.mrb[12].mxu0 %vm153_vm3, %v628_v62  ;;  %v2950_v62 = vld [vmem:[%s3158_s3 + $0x30] ss:$8 sps:$4 sm:$0xff]  }
 0x90a   :  { %2317 = vmatprep.mubr.msk.bf16.mxu0 %vm2677_vm4, %v2676_v10  ;;  %2310 = vmatpush3.bf16.msra.mxu0 %v2566_v63 }
 0x90b   :  { %2311 = vmatprep.subr.bf16.mxu0 %v2676_v10 }
 0x90e   :  { %2312 = vmatpush3.bf16.msra.mxu0 %v2567_v0 }
 0x90f   :  { %2313 = vmatprep.subr.bf16.mxu0 %v2676_v10 }
 0x912   :  { %2314 = vmatpush3.bf16.msra.mxu0 %v2568_v1 }
 0x913   :  { %2315 = vmatprep.subr.bf16.mxu0 %v2676_v10 }
 0x916   :  { %2316 = vmatpush3.bf16.msra.mxu0 %v2569_v2 }
 0x917   :  { %2321 = vmatprep.subr.bf16.mxu0 %v2676_v10 }
 0x9dc   :  { %v678_v3 = vpop.f32.mrb[12].mxu0 }
 0x9dd   :  { %v679_v4 = vadd.f32 %v678_v3, %v632_v40  ;;  %v2307_v5 = vpop.f32.mrb[13].mxu0 }
 0x9de   :  { %v681_v6 = vpop.f32.mrb[14].mxu0 }
 0x9df   :  { %v685_v7 = vmul.f32 %v679_v4, %v679_v4  ;;  %v682_v8 = vadd.f32 %v681_v6, %v632_v40  ;;  %v2308_v9 = vpop.f32.mrb[15].mxu0  ;;  %v814_v6 = vsub.s32 7, %v2814_v58 }
 0x9e1   :  { %v687_v11 = vmul.f32 %v685_v7, %v679_v4  ;;  %v686_v12 = vmul.f32 %v682_v8, %v682_v8 }
 0x9e3   :  { %v689_v13 = vmul.f32 0.044715, %v687_v11  ;;  %v688_v14 = vmul.f32 %v686_v12, %v682_v8 }
 0x9e5   :  { %v691_v16 = vadd.f32 %v689_v13, %v679_v4  ;;  %v690_v17 = vmul.f32 0.044715, %v688_v14  ;;  %v815_v13 = vrot.slane %v2822_v60, %v814_v6 }
 0x9e7   :  { %v693_v18 = vmul.f32 0.7978846, %v691_v16  ;;  %v692_v19 = vadd.f32 %v690_v17, %v682_v8 }
 0x9e9   :  { %2596 = vtanh.f32 %v693_v18  ;;  %v694_v20 = vmul.f32 0.7978846, %v692_v19  ;;  %v2974_v19 = vld [vmem:[%s3160_s5 + $0x8] sm:$0xff] }
 0x9eb   :  { %2598 = vtanh.f32 %v694_v20 }
 0x9f3   :  { %v2597_v22 = vpop.eup %2596 }
 0x9f4   :  { %v697_v23 = vadd.f32 1.0, %v2597_v22 }
 0x9f5   :  { %v2599_v24 = vpop.eup %2598 }
 0x9f6   :  { %v699_v25 = vmul.f32 0.5, %v697_v23  ;;  %v698_v26 = vadd.f32 1.0, %v2599_v24 }
 0x9f8   :  { %v700_v27 = vmul.f32 0.5, %v698_v26  ;;  %v701_v28 = vmul.f32 %v699_v25, %v679_v4  ;;  %v808_v4 = vsub.s32 6, %v2814_v58 }
 0x9fa   :  { %v702_v30 = vmul.f32 %v700_v27, %v682_v8  ;;  %v809_v5 = vrot.slane %v2822_v60, %v808_v4  ;;  %v838_v60 = vrot.slane %v2974_v19, %v2817_v59 }
 0x9fc   :  { %v703_v31 = vpack.c.bf16 %v702_v30, %v701_v28 }
 0x9fe   :  { %2318 = vmatmul.mubr.msk.bf16.vlgmr.msra.gmra.mrb[16].mxu0 %vm67_vm0, %v703_v31 }
 0x9ff   :  { %2325 = vmatprep.mubr.msk.bf16.mxu0 %vm2677_vm4, %v2676_v10 }
 0xad1   :  { %v765_v34 = vpop.f32.mrb[16].mxu0 }
 0xad2   :  { %v772_v55 = vadd.f32 %v765_v34, %v626_v57  ;;  %v2319_v35 = vpop.f32.mrb[17].mxu0 }
 0xad3   :  { %v768_v36 = vpop.f32.mrb[18].mxu0 }
 0xad4   :  { %v773_v56 = vadd.f32 %v768_v36, %v627_v61  ;;  %v2320_v37 = vpop.f32.mrb[19].mxu0  ;;  %v778_v38 = vadd.f32 %v777_v33, %v772_v55  ;;  %v2943_v61 = vld [vmem:[%s3158_s3 + $0x20] ss:$8 sps:$4 sm:$0xff]  }
 0xad5   :  { %2322 = vmatpush3.bf16.msra.mxu0 %v2943_v61 }
 0xad6   :  { %v780_v41 = vsel %vm153_vm3, %v778_v38, 0.0  ;;  %v779_v42 = vadd.f32 %v777_v33, %v773_v56  ;;  %2323 = vmatprep.subr.bf16.mxu0 %v2676_v10 }
 0xad7   :  { %781 = vadd.xlane.f32.xlu0 %v780_v41 }
 0xad8   :  { %v783_v43 = vsel %vm153_vm3, %v779_v42, 0.0 }
 0xad9   :  { %784 = vadd.xlane.f32.xlu1 %v783_v43  ;;  %2324 = vmatpush3.bf16.msra.mxu0 %v2950_v62 }
 0xada   :  { %2329 = vmatprep.subr.bf16.mxu0 %v2676_v10 }
 0xb64   :  { %v782_v44 = vpop.xlane.xlu0 %781 }
 0xb65   :  { %v786_v46 = vmul.f32 0.03125, %v782_v44 }
 0xb66   :  { %v785_v47 = vpop.xlane.xlu1 %784 }
 0xb67   :  { %v788_v48 = vsub.f32 %v778_v38, %v786_v46  ;;  %v787_v50 = vmul.f32 0.03125, %v785_v47 }
 0xb69   :  { %v789_v51 = vsub.f32 %v779_v42, %v787_v50  ;;  %v790_v52 = vmul.f32 %v788_v48, %v788_v48 }
 0xb6b   :  { %v792_v53 = vsel %vm153_vm3, %v790_v52, 0.0  ;;  %v791_v54 = vmul.f32 %v789_v51, %v789_v51 }
 0xb6c   :  { %793 = vadd.xlane.f32.xlu0 %v792_v53 }
 0xb6d   :  { %v795_v57 = vsel %vm153_vm3, %v791_v54, 0.0 }
 0xb6e   :  { %796 = vadd.xlane.f32.xlu1 %v795_v57 }
 0xbf9   :  { %v794_v63 = vpop.xlane.xlu0 %793 }
 0xbfa   :  { %v798_v0 = vmul.f32 0.03125, %v794_v63 }
 0xbfb   :  { %v797_v1 = vpop.xlane.xlu1 %796 }
 0xbfc   :  { %v800_v2 = vadd.f32 1e-12, %v798_v0  ;;  %v799_v40 = vmul.f32 0.03125, %v797_v1 }
 0xbfe   :  { %2600 = vrsqrt.f32 %v800_v2  ;;  %v801_v3 = vadd.f32 1e-12, %v799_v40 }
 0xc00   :  { %2602 = vrsqrt.f32 %v801_v3 }
 0xc08   :  { %v2601_v7 = vpop.eup %2600 }
 0xc09   :  { %v804_v8 = vmul.f32 %v2601_v7, %v788_v48 }
 0xc0a   :  { %v2603_v9 = vpop.eup %2602 }
 0xc0b   :  { %v810_v11 = vmul.f32 %v809_v5, %v804_v8  ;;  %v805_v12 = vmul.f32 %v2603_v9, %v789_v51 }
 0xc0d   :  { %v811_v14 = vmul.f32 %v809_v5, %v805_v12  ;;  %v2962_v16 = vadd.f32 %v815_v13, %v810_v11 }
 0xc0f   :  { %v2964_v17 = vadd.f32 %v815_v13, %v811_v14 }
 0xc11   :  { %v834_v18 = vpack.c.bf16 %v2964_v17, %v2962_v16 }
 0xc13   :  { %2326 = vmatmul.mubr.msk.bf16.vlgmr.msra.gmra.mrb[20].mxu0 %vm153_vm3, %v834_v18 }
 0xc14   :  { %2331 = vmatprep.mubr.msk.bf16.mxu0 %vm2677_vm4, %v2676_v10 }
 0xce6   :  { %v888_v20 = vpop.f32.mrb[20].mxu0 }
 0xce7   :  { %v889_v22 = vadd.f32 %v888_v20, %v838_v60  ;;  %v2327_v23 = vpop.f32.mrb[21].mxu0 }
 0xce8   :  { %v891_v24 = vpop.f32.mrb[22].mxu0 }
 0xce9   :  { %v2146_v25 = vpack.c.bf16 %v889_v22, %v889_v22  ;;  %v892_v26 = vadd.f32 %v891_v24, %v838_v60  ;;  %v2328_v27 = vpop.f32.mrb[23].mxu0 }
 0xceb   :  { %v2147_v28 = vpack.c.bf16 %v892_v26, %v892_v26  ;;  %901 = vrot.lane.b32.xlu0 %v2146_v25, %s2678_s22 }
 0xced   :  { %949 = vrot.lane.b32.xlu1 %v2147_v28, %s2678_s22 }
 0xd5d   :  { %v902_v30 = vpop.permute.xlu0 %901 }
 0xd5e   :  { %v907_v31 = vsel %vm153_vm3, %v902_v30, 0 }
 0xd5f   :  { %2330 = vmatpush3.bf16.xpose.msra.mxu0 %v907_v31  ;;  %v950_v33 = vpop.permute.xlu1 %949 }
 0xd60   :  { %v955_v34 = vsel %vm153_vm3, %v950_v33, 0  ;;  %2341 = vmatprep.subr.bf16.mxu0 %v2676_v10 }
 0xd61   :  { %2336 = vmatpush3.bf16.xpose.msra.mxu1 %v955_v34 }
 0xd62   :  { %2347 = vmatprep.subr.bf16.mxu1 %v2676_v10 }
 0xd66   :  { %2332 = vmatmul.mubr.msk.bf16.vlgmr.msra.gmra.mrb[24].mxu0 %vm153_vm3, %v2146_v25 }
 0xd67   :  { %2343 = vmatprep.mubr.msk.bf16.mxu0 %vm2677_vm4, %v2676_v10 }
 0xd68   :  { %2338 = vmatmul.mubr.msk.bf16.vlgmr.msra.gmra.mrb[16].mxu1 %vm153_vm3, %v2147_v28 }
 0xd69   :  { %2349 = vmatprep.mubr.msk.bf16.mxu1 %vm2677_vm4, %v2676_v10 }
 0xe39   :  { %v943_v59 = vpop.f32.mrb[24].mxu0 }
 0xe3a   :  { %v997_v55 = vmul.f32 0.17677669, %v943_v59  ;;  %v2333_v35 = vpop.f32.mrb[25].mxu0 }
 0xe3b   :  { %v946_v36 = vpop.f32.mrb[26].mxu0  ;;  %v991_v56 = vpop.f32.mrb[16].mxu1 }
 0xe3c   :  { %v998_v37 = vmul.f32 0.17677669, %v991_v56  ;;  %v2334_v38 = vpop.f32.mrb[27].mxu0  ;;  %v2339_v41 = vpop.f32.mrb[17].mxu1  ;;  %v999_v42 = vadd.f32 %v997_v55, %v2847_v21 }
 0xe3d   :  { %v994_v43 = vpop.f32.mrb[18].mxu1 }
 0xe3e   :  { %v2340_v44 = vpop.f32.mrb[19].mxu1  ;;  %v1001_v46 = vsel %vm409_vm5, %v999_v42, -inf  ;;  %v1000_v47 = vadd.f32 %v998_v37, %v2851_v29 }
 0xe3f   :  { %1002 = vmax.xlane.f32.xlu1 %v1001_v46 }
 0xe40   :  { %v1004_v48 = vsel %vm409_vm5, %v1000_v47, -inf }
 0xe41   :  { %1005 = vmax.xlane.f32.xlu0 %v1004_v48  ;;  %v2574_v48 = vld [vmem:[%s3158_s3 + $0x24] ss:$8 sps:$4 sm:$0xff]  }
 0xecc   :  { %v1003_v50 = vpop.xlane.xlu1 %1002 }
 0xecd   :  { %v1007_v51 = vsub.f32 %v999_v42, %v1003_v50  ;;  %v2575_v50 = vld [vmem:[%s3158_s3 + $0x34] ss:$8 sps:$4 sm:$0xff]  }
 0xece   :  { %v1006_v52 = vpop.xlane.xlu0 %1005 }
 0xecf   :  { %v1009_v53 = vmul.f32 1.442695, %v1007_v51  ;;  %v1008_v54 = vsub.f32 %v1000_v47, %v1006_v52 }
 0xed1   :  { %2604 = vpow2.f32 %v1009_v53  ;;  %v1011_v57 = vmul.f32 1.442695, %v1008_v54 }
 0xed3   :  { %2606 = vpow2.f32 %v1011_v57 }
 0xedb   :  { %v2605_v63 = vpop.eup %2604 }
 0xedc   :  { %v1013_v21 = vsel %vm409_vm5, %v2605_v63, 0.0 }
 0xedd   :  { %v2607_v0 = vpop.eup %2606  ;;  %1014 = vadd.xlane.f32.xlu0 %v1013_v21  ;;  %v1209_v21 = vrot.slane %v2974_v19, %v618_v45  ;;  %v2576_v45 = vld [vmem:[%s3159_s4 + $0x20] sm:$0xff]  }
 0xede   :  { %v1016_v1 = vsel %vm409_vm5, %v2607_v0, 0.0 }
 0xedf   :  { %1017 = vadd.xlane.f32.xlu1 %v1016_v1 }
 0xef0   :  { %1073 = vrot.lane.b32.xlu1 %v2147_v28, %s2680_s1  ;;  %v1177_v28 = vrot.slane %v2974_v19, %v586_v15 }
 0xef3   :  { %1025 = vrot.lane.b32.xlu0 %v2146_v25, %s2680_s1 }
 0xef4   :  { %1122 = vrot.lane.b32.xlu1 %v2943_v61, %s2681_s24 }
 0xef7   :  { %1124 = vrot.lane.b32.xlu0 %v2950_v62, %s2681_s24 }
 0xf6a   :  { %v1015_v29 = vpop.xlane.xlu0 %1014 }
 0xf6b   :  { %2608 = vrcp.f32 %v1015_v29 }
 0xf6c   :  { %v1018_v2 = vpop.xlane.xlu1 %1017 }
 0xf6d   :  { %2610 = vrcp.f32 %v1018_v2 }
 0xf6e   :  { %v1026_v40 = vpop.permute.xlu0 %1025 }
 0xf6f   :  { %v1031_v3 = vsel %vm439_vm6, %v1026_v40, 0 }
 0xf70   :  { %v1074_v5 = vpop.permute.xlu1 %1073  ;;  %2342 = vmatpush3.bf16.msra.mxu0 %v1031_v3  ;;  %v1215_v3 = vrot.slane %v2974_v19, %v624_v49  ;;  %v2577_v49 = vld [vmem:[%s3159_s4 + $0x28] sm:$0xff]  }
 0xf71   :  { %v1079_v7 = vsel %vm439_vm6, %v1074_v5, 0  ;;  %2353 = vmatprep.subr.bf16.mxu0 %v2676_v10 }
 0xf72   :  { %2348 = vmatpush3.bf16.msra.mxu1 %v1079_v7  ;;  %v1125_v14 = vpop.permute.xlu0 %1124 }
 0xf73   :  { %2361 = vmatprep.subr.bf16.mxu1 %v2676_v10 }
 0xf74   :  { %v1123_v12 = vpop.permute.xlu1 %1122 }
 0xf75   :  { %v2609_v61 = vpop.eup %2608 }
 0xf76   :  { %v1021_v8 = vmul.f32 %v2609_v61, %v2605_v63 }
 0xf77   :  { %v2611_v9 = vpop.eup %2610 }
 0xf78   :  { %v1022_v62 = vmul.f32 %v2611_v9, %v2607_v0  ;;  %v1023_v11 = vpack.c.bf16 %v1021_v8, %v1021_v8  ;;  %v2578_v9 = vld [vmem:[%s3159_s4 + $0x30] sm:$0xff]  }
 0xf7a   :  { %2344 = vmatmul.mubr.msk.bf16.vlgmr.msra.gmra.mrb[28].mxu0 %vm409_vm5, %v1023_v11  ;;  %v1024_v13 = vpack.c.bf16 %v1022_v62, %v1022_v62  ;;  %v2579_v62 = vld [vmem:[%s3159_s4 + $0x38] sm:$0xff]   ;;  %v1222_v11 = vrot.slane %v2974_v19, %v631_v39 }
 0xf7b   :  { %2354 = vmatpush3.bf16.msra.mxu0 %v1123_v12  ;;  %2357 = vmatprep.mubr.msk.bf16.mxu0 %vm2677_vm4, %v2676_v10 }
 0xf7c   :  { %2350 = vmatmul.mubr.msk.bf16.vlgmr.msra.gmra.mrb[20].mxu1 %vm409_vm5, %v1024_v13  ;;  %2355 = vmatprep.subr.bf16.mxu0 %v2676_v10 }
 0xf7d   :  { %2365 = vmatprep.mubr.msk.bf16.mxu1 %vm2677_vm4, %v2676_v10  ;;  %2362 = vmatpush3.bf16.msra.mxu1 %v2574_v48 }
 0xf7e   :  { %2363 = vmatprep.subr.bf16.mxu1 %v2676_v10 }
 0xf7f   :  { %2356 = vmatpush3.bf16.msra.mxu0 %v1125_v14 }
 0xf80   :  { %2369 = vmatprep.subr.bf16.mxu0 %v2676_v10 }
 0xf81   :  { %2364 = vmatpush3.bf16.msra.mxu1 %v2575_v50 }
0x104d   :  { %v1067_v18 = vpop.f32.mrb[28].mxu0 }
0x104e   :  { %v2345_v60 = vpop.f32.mrb[29].mxu0 }
0x104f   :  { %v1070_v20 = vpop.f32.mrb[30].mxu0  ;;  %v1115_v22 = vpop.f32.mrb[20].mxu1 }
0x1050   :  { %v1121_v23 = vpack.c.bf16 %v1115_v22, %v1067_v18  ;;  %v2346_v24 = vpop.f32.mrb[31].mxu0  ;;  %v2351_v25 = vpop.f32.mrb[21].mxu1 }
0x1051   :  { %v1118_v26 = vpop.f32.mrb[22].mxu1 }
0x1052   :  { %v2352_v27 = vpop.f32.mrb[23].mxu1  ;;  %2358 = vmatmul.mubr.msk.bf16.vlgmr.msra.gmra.mrb[32].mxu0 %vm153_vm3, %v1121_v23 }
0x1053   :  { %2377 = vmatprep.mubr.msk.bf16.mxu0 %vm2677_vm4, %v2676_v10  ;;  %2370 = vmatpush3.bf16.msra.mxu0 %v2576_v45  ;;  %v1500_v45 = vld [vmem:[#allocation2 + $0x38] sm:$0xff] }
0x1054   :  { %2371 = vmatprep.subr.bf16.mxu0 %v2676_v10 }
0x1057   :  { %2372 = vmatpush3.bf16.msra.mxu0 %v2577_v49 }
0x1058   :  { %2373 = vmatprep.subr.bf16.mxu0 %v2676_v10 }
0x105b   :  { %2374 = vmatpush3.bf16.msra.mxu0 %v2578_v9  ;;  %v1416_v9 = vld [vmem:[#allocation2 + $0x10] sm:$0xff] }
0x105c   :  { %2375 = vmatprep.subr.bf16.mxu0 %v2676_v10 }
0x105f   :  { %2376 = vmatpush3.bf16.msra.mxu0 %v2579_v62  ;;  %v1417_v62 = vld [vmem:[#allocation2 + $0x18] sm:$0xff] }
0x1125   :  { %v1165_v30 = vpop.f32.mrb[32].mxu0 }
0x1126   :  { %v1172_v31 = vadd.f32 %v1165_v30, %v2962_v16  ;;  %v2359_v33 = vpop.f32.mrb[33].mxu0 }
0x1127   :  { %v1168_v34 = vpop.f32.mrb[34].mxu0 }
0x1128   :  { %v1173_v59 = vadd.f32 %v1168_v34, %v2964_v17  ;;  %v2360_v55 = vpop.f32.mrb[35].mxu0  ;;  %v1178_v35 = vadd.f32 %v1177_v28, %v1172_v31 }
0x112a   :  { %v1180_v36 = vsel %vm153_vm3, %v1178_v35, 0.0  ;;  %v1179_v56 = vadd.f32 %v1177_v28, %v1173_v59 }
0x112b   :  { %1181 = vadd.xlane.f32.xlu1 %v1180_v36 }
0x112c   :  { %v1183_v37 = vsel %vm153_vm3, %v1179_v56, 0.0 }
0x112d   :  { %1184 = vadd.xlane.f32.xlu0 %v1183_v37 }
0x11b8   :  { %v1182_v38 = vpop.xlane.xlu1 %1181 }
0x11b9   :  { %v1186_v41 = vmul.f32 0.03125, %v1182_v38 }
0x11ba   :  { %v1185_v42 = vpop.xlane.xlu0 %1184 }
0x11bb   :  { %v1188_v15 = vsub.f32 %v1178_v35, %v1186_v41  ;;  %v1187_v43 = vmul.f32 0.03125, %v1185_v42  ;;  %v1367_v41 = vrot.slane %v2974_v19, %v776_v32 }
0x11bd   :  { %v1189_v44 = vsub.f32 %v1179_v56, %v1187_v43  ;;  %v1190_v16 = vmul.f32 %v1188_v15, %v1188_v15 }
0x11bf   :  { %v1192_v46 = vsel %vm153_vm3, %v1190_v16, 0.0  ;;  %v1191_v47 = vmul.f32 %v1189_v44, %v1189_v44 }
0x11c0   :  { %1193 = vadd.xlane.f32.xlu0 %v1192_v46 }
0x11c1   :  { %v1195_v17 = vsel %vm153_vm3, %v1191_v47, 0.0 }
0x11c2   :  { %1196 = vadd.xlane.f32.xlu1 %v1195_v17 }
0x124d   :  { %v1194_v51 = vpop.xlane.xlu0 %1193 }
0x124e   :  { %v1198_v52 = vmul.f32 0.03125, %v1194_v51 }
0x124f   :  { %v1197_v53 = vpop.xlane.xlu1 %1196 }
0x1250   :  { %v1200_v54 = vadd.f32 1e-12, %v1198_v52  ;;  %v1199_v57 = vmul.f32 0.03125, %v1197_v53 }
0x1252   :  { %2612 = vrsqrt.f32 %v1200_v54  ;;  %v1201_v63 = vadd.f32 1e-12, %v1199_v57 }
0x1254   :  { %2614 = vrsqrt.f32 %v1201_v63 }
0x125c   :  { %v2613_v0 = vpop.eup %2612 }
0x125d   :  { %v1204_v1 = vmul.f32 %v2613_v0, %v1188_v15 }
0x125e   :  { %v2615_v29 = vpop.eup %2614 }
0x125f   :  { %v1210_v2 = vmul.f32 %v1209_v21, %v1204_v1  ;;  %v1205_v40 = vmul.f32 %v2615_v29, %v1189_v44  ;;  %v1497_v29 = vld [vmem:[#allocation2 + $0x20] sm:$0xff] }
0x1261   :  { %v1211_v5 = vmul.f32 %v1209_v21, %v1205_v40  ;;  %v1216_v7 = vadd.f32 %v1215_v3, %v1210_v2  ;;  %v1498_v2 = vld [vmem:[#allocation2 + $0x28] sm:$0xff] }
0x1262   :  { %v2492_v40 = vpack.c.bf16 %v1498_v2, %v1497_v29  ;;  %v1823_v29 = vld [vmem:[#allocation2 + $0xb8] sm:$0xff] }
0x1263   :  { %v1217_v61 = vadd.f32 %v1215_v3, %v1211_v5  ;;  %v2682_v3 = vmov 0.0|0.0   ;;  %v1414_v5 = vld [vmem:[#allocation2] sm:$0xff] }
0x1264   :  { %2491 = vmatprep.subr.bf16.mxu1 %v2682_v3  ;;  %2485 = vmatprep.subr.bf16.mxu0 %v2682_v3 }
0x1265   :  { %v1218_v8 = vpack.c.bf16 %v1217_v61, %v1216_v7 }
0x1267   :  { %2366 = vmatmul.mubr.msk.bf16.vlgmr.msra.gmra.mrb[24].mxu1 %vm153_vm3, %v1218_v8  ;;  %v1499_v8 = vld [vmem:[#allocation2 + $0x30] sm:$0xff] }
0x1268   :  { %2400 = vmatprep.mubr.msk.f32.mxu1 %vm2677_vm4, %v2676_v10  ;;  %2493 = vmatpush3.bf16.msra.mxu1 %v2492_v40  ;;  %v2495_v49 = vpack.c.bf16 %v1500_v45, %v1499_v8 }
0x1269   :  { %2494 = vmatprep.subr.bf16.mxu1 %v2682_v3 }
0x126c   :  { %2496 = vmatpush3.bf16.msra.mxu1 %v2495_v49  ;;  %v1903_v49 = vld [vmem:[#allocation2 + $0xd0] sm:$0xff] }
0x126d   :  { %2497 = vmatprep.subr.bf16.mxu1 %v2682_v3 }
0x133a   :  { %v1268_v12 = vpop.f32.mrb[24].mxu1 }
0x133b   :  { %v1269_v13 = vadd.f32 %v1268_v12, %v1222_v11  ;;  %v2367_v14 = vpop.f32.mrb[25].mxu1 }
0x133c   :  { %v1271_v18 = vpop.f32.mrb[26].mxu1 }
0x133d   :  { %v1275_v60 = vmul.f32 %v1269_v13, %v1269_v13  ;;  %v1272_v20 = vadd.f32 %v1271_v18, %v1222_v11  ;;  %v2368_v22 = vpop.f32.mrb[27].mxu1  ;;  %v2489_v11 = vpack.c.bf16 %v1417_v62, %v1416_v9  ;;  %v1904_v9 = vld [vmem:[#allocation2 + $0xd8] sm:$0xff] }
0x133e   :  { %v1399_v22 = vrot.slane %v2974_v19, %v808_v4 }
0x133f   :  { %v1277_v23 = vmul.f32 %v1275_v60, %v1269_v13  ;;  %v1276_v24 = vmul.f32 %v1272_v20, %v1272_v20 }
0x1341   :  { %v1279_v25 = vmul.f32 0.044715, %v1277_v23  ;;  %v1278_v26 = vmul.f32 %v1276_v24, %v1272_v20  ;;  %v1405_v24 = vrot.slane %v2974_v19, %v814_v6 }
0x1343   :  { %v1281_v27 = vadd.f32 %v1279_v25, %v1269_v13  ;;  %v1280_v28 = vmul.f32 0.044715, %v1278_v26 }
0x1345   :  { %v1283_v30 = vmul.f32 0.7978846, %v1281_v27  ;;  %v1282_v31 = vadd.f32 %v1280_v28, %v1272_v20 }
0x1347   :  { %2616 = vtanh.f32 %v1283_v30  ;;  %v1284_v33 = vmul.f32 0.7978846, %v1282_v31  ;;  %v1577_v30 = vld [vmem:[#allocation2 + $0x40] sm:$0xff]  ;;  %v1578_v31 = vld [vmem:[#allocation2 + $0x48] sm:$0xff] }
0x1348   :  { %v2498_v4 = vpack.c.bf16 %v1578_v31, %v1577_v30  ;;  %v2135_v31 = vld [vmem:[%s3157_s2 + $0x4a] ss:$0 sm:$0xff] }
0x1349   :  { %2618 = vtanh.f32 %v1284_v33 }
0x1351   :  { %v2617_v34 = vpop.eup %2616 }
0x1352   :  { %v1287_v39 = vadd.f32 1.0, %v2617_v34 }
0x1353   :  { %v2619_v59 = vpop.eup %2618 }
0x1354   :  { %v1289_v55 = vmul.f32 0.5, %v1287_v39  ;;  %v1288_v35 = vadd.f32 1.0, %v2619_v59 }
0x1356   :  { %v1290_v36 = vmul.f32 0.5, %v1288_v35  ;;  %v1291_v56 = vmul.f32 %v1289_v55, %v1269_v13  ;;  %v1579_v55 = vld [vmem:[#allocation2 + $0x50] sm:$0xff]  ;;  %v1580_v35 = vld [vmem:[#allocation2 + $0x58] sm:$0xff] }
0x1358   :  { %v1292_v37 = vmul.f32 %v1290_v36, %v1272_v20  ;;  %v2501_v36 = vpack.c.bf16 %v1580_v35, %v1579_v55 }
0x135a   :  { %v1293_v38 = vpack.c.bf16 %v1292_v37, %v1291_v56  ;;  %v1658_v56 = vld [vmem:[#allocation2 + $0x60] sm:$0xff]  ;;  %v1659_v37 = vld [vmem:[#allocation2 + $0x68] sm:$0xff] }
0x135c   :  { %2378 = vmatmul.mubr.msk.bf16.vlgmr.msra.gmra.mrb[36].mxu0 %vm67_vm0, %v1293_v38 }
0x135d   :  { %2389 = vmatprep.mubr.msk.f32.mxu0 %vm2677_vm4, %v2676_v10 }
0x142f   :  { %v1355_v42 = vpop.f32.mrb[36].mxu0 }
0x1430   :  { %v1362_v15 = vadd.f32 %v1355_v42, %v1216_v7  ;;  %v2379_v43 = vpop.f32.mrb[37].mxu0  ;;  %v1415_v7 = vld [vmem:[#allocation2 + $0x8] sm:$0xff]  ;;  %v2504_v42 = vpack.c.bf16 %v1659_v37, %v1658_v56 }
0x1431   :  { %v1358_v44 = vpop.f32.mrb[38].mxu0  ;;  %v1661_v43 = vld [vmem:[#allocation2 + $0x78] sm:$0xff] }
0x1432   :  { %v1363_v16 = vadd.f32 %v1358_v44, %v1217_v61  ;;  %v2380_v46 = vpop.f32.mrb[39].mxu0  ;;  %v1368_v47 = vadd.f32 %v1367_v41, %v1362_v15  ;;  %v2486_v61 = vpack.c.bf16 %v1415_v7, %v1414_v5  ;;  %v1660_v15 = vld [vmem:[#allocation2 + $0x70] sm:$0xff]  ;;  %v1901_v5 = vld [vmem:[#allocation2 + $0xc0] sm:$0xff]  ;;  %v1902_v7 = vld [vmem:[#allocation2 + $0xc8] sm:$0xff] }
0x1433   :  { %v1739_v46 = vld [vmem:[#allocation2 + $0x80] sm:$0xff]  ;;  %v2522_v45 = vpack.c.bf16 %v1902_v7, %v1901_v5 }
0x1434   :  { %v1370_v17 = vsel %vm153_vm3, %v1368_v47, 0.0  ;;  %v1369_v48 = vadd.f32 %v1367_v41, %v1363_v16  ;;  %2487 = vmatpush3.bf16.msra.mxu0 %v2486_v61  ;;  %v2507_v16 = vpack.c.bf16 %v1661_v43, %v1660_v15 }
0x1435   :  { %1371 = vadd.xlane.f32.xlu0 %v1370_v17  ;;  %2488 = vmatprep.subr.bf16.mxu0 %v2682_v3 }
0x1436   :  { %v1373_v50 = vsel %vm153_vm3, %v1369_v48, 0.0 }
0x1437   :  { %1374 = vadd.xlane.f32.xlu1 %v1373_v50 }
0x1438   :  { %2490 = vmatpush3.bf16.msra.mxu0 %v2489_v11  ;;  %v2525_v11 = vpack.c.bf16 %v1904_v9, %v1903_v49 }
0x14c2   :  { %v1372_v51 = vpop.xlane.xlu0 %1371 }
0x14c3   :  { %v1376_v52 = vmul.f32 0.03125, %v1372_v51  ;;  %v1741_v51 = vld [vmem:[#allocation2 + $0x90] sm:$0xff] }
0x14c4   :  { %v1375_v53 = vpop.xlane.xlu1 %1374 }
0x14c5   :  { %v1378_v54 = vsub.f32 %v1368_v47, %v1376_v52  ;;  %v1377_v57 = vmul.f32 0.03125, %v1375_v53  ;;  %v1740_v47 = vld [vmem:[#allocation2 + $0x88] sm:$0xff]  ;;  %v1742_v52 = vld [vmem:[#allocation2 + $0x98] sm:$0xff] }
0x14c6   :  { %v2510_v50 = vpack.c.bf16 %v1740_v47, %v1739_v46 }
0x14c7   :  { %v1379_v32 = vsub.f32 %v1369_v48, %v1377_v57  ;;  %v1380_v63 = vmul.f32 %v1378_v54, %v1378_v54  ;;  %v1820_v57 = vld [vmem:[#allocation2 + $0xa0] sm:$0xff] }
0x14c9   :  { %v1382_v21 = vsel %vm153_vm3, %v1380_v63, 0.0  ;;  %v1381_v0 = vmul.f32 %v1379_v32, %v1379_v32 }
0x14ca   :  { %1383 = vadd.xlane.f32.xlu0 %v1382_v21 }
0x14cb   :  { %v1385_v1 = vsel %vm153_vm3, %v1381_v0, 0.0 }
0x14cc   :  { %1386 = vadd.xlane.f32.xlu1 %v1385_v1  ;;  %v1822_v1 = vld [vmem:[#allocation2 + $0xb0] sm:$0xff] }
0x14cd   :  { %v2519_v40 = vpack.c.bf16 %v1823_v29, %v1822_v1 }
0x1557   :  { %v1384_v12 = vpop.xlane.xlu0 %1383 }
0x1558   :  { %v1388_v13 = vmul.f32 0.03125, %v1384_v12  ;;  %v1982_v12 = vld [vmem:[#allocation2 + $0xe0] sm:$0xff] }
0x1559   :  { %v1387_v14 = vpop.xlane.xlu1 %1386 }
0x155a   :  { %v1390_v18 = vadd.f32 1e-12, %v1388_v13  ;;  %v1389_v60 = vmul.f32 0.03125, %v1387_v14  ;;  %v1983_v13 = vld [vmem:[#allocation2 + $0xe8] sm:$0xff] }
0x155c   :  { %2620 = vrsqrt.f32 %v1390_v18  ;;  %v1391_v20 = vadd.f32 1e-12, %v1389_v60  ;;  %v2528_v60 = vpack.c.bf16 %v1983_v13, %v1982_v12 }
0x155e   :  { %2622 = vrsqrt.f32 %v1391_v20  ;;  %v1984_v20 = vld [vmem:[#allocation2 + $0xf0] sm:$0xff] }
0x1566   :  { %v2621_v23 = vpop.eup %2620 }
0x1567   :  { %v1394_v25 = vmul.f32 %v2621_v23, %v1378_v54  ;;  %v2513_v54 = vpack.c.bf16 %v1742_v52, %v1741_v51 }
0x1568   :  { %v2623_v26 = vpop.eup %2622 }
0x1569   :  { %v1400_v27 = vmul.f32 %v1399_v22, %v1394_v25  ;;  %v1395_v28 = vmul.f32 %v2623_v26, %v1379_v32  ;;  %v1821_v32 = vld [vmem:[#allocation2 + $0xa8] sm:$0xff] }
0x156a   :  { %v2516_v0 = vpack.c.bf16 %v1821_v32, %v1820_v57 }
0x156b   :  { %v3081_v33 = vadd.f32 %v1405_v24, %v1400_v27  ;;  %v1401_v34 = vmul.f32 %v1399_v22, %v1395_v28  ;;  %v1985_v22 = vld [vmem:[#allocation2 + $0xf8] sm:$0xff] }
0x156d   :  { %v3083_v39 = vadd.f32 %v1405_v24, %v1401_v34  ;;  %v1501_v59 = vrot.slane %v3081_v33, 1  ;;  %v1581_v41 = vrot.slane %v3081_v33, 2  ;;  %v1662_v48 = vrot.slane %v3081_v33, 3 }
0x156e   :  { %v1743_v21 = vrot.slane %v3081_v33, 4  ;;  %v1824_v8 = vrot.slane %v3081_v33, 5  ;;  %v1905_v18 = vrot.slane %v3081_v33, 6  ;;  %v2531_v24 = vpack.c.bf16 %v1985_v22, %v1984_v20 }
0x156f   :  { %v1502_v58 = vsel %vm1421_vm7, %v3083_v39, %v1501_v59  ;;  %v1420_v6 = vrot.slane %v3083_v39, 7  ;;  %v1582_v38 = vrot.slane %v3083_v39, 1  ;;  %v1663_v17 = vrot.slane %v3083_v39, 2 }
0x1570   :  { %2401 = vmatmul.mubr.msk.f32.vlgmr.msra.gmra.mrb[28].mxu1 %vm153_vm3, %v1502_v58  ;;  %v1744_v63 = vrot.slane %v3083_v39, 3  ;;  %v1825_v61 = vrot.slane %v3083_v39, 4  ;;  %v1906_v14 = vrot.slane %v3083_v39, 5  ;;  %v1987_v25 = vrot.slane %v3083_v39, 6 }
0x1571   :  { %2499 = vmatpush3.bf16.msra.mxu1 %v2498_v4  ;;  %v1422_v19 = vsel %vm1421_vm7, %v1420_v6, %v3081_v33  ;;  %2411 = vmatprep.mubr.msk.f32.mxu1 %vm2677_vm4, %v2676_v10  ;;  %v1583_v44 = vsel %vm1421_vm7, %v1582_v38, %v1581_v41  ;;  %v1664_v53 = vsel %vm1421_vm7, %v1663_v17, %v1662_v48  ;;  %v1986_v26 = vrot.slane %v3081_v33, 7 }
0x1572   :  { %2390 = vmatmul.mubr.msk.f32.vlgmr.msra.gmra.mrb[2].mxu0 %vm153_vm3, %v1422_v19  ;;  %2500 = vmatprep.subr.bf16.mxu1 %v2682_v3  ;;  %v1745_v2 = vsel %vm1421_vm7, %v1744_v63, %v1743_v21  ;;  %v1826_v62 = vsel %vm1421_vm7, %v1825_v61, %v1824_v8  ;;  %v1907_v23 = vsel %vm1421_vm7, %v1906_v14, %v1905_v18 }
0x1573   :  { %v1988_v27 = vsel %vm1421_vm7, %v1987_v25, %v1986_v26 }
0x1575   :  { %2502 = vmatpush3.bf16.msra.mxu1 %v2501_v36 }
0x1576   :  { %2503 = vmatprep.subr.bf16.mxu1 %v2682_v3 }
0x1578   :  { %2412 = vmatmul.mubr.msk.f32.vlgmr.msra.gmra.mrb[28].mxu1 %vm153_vm3, %v1583_v44 }
0x1579   :  { %2505 = vmatpush3.bf16.msra.mxu1 %v2504_v42  ;;  %2422 = vmatprep.mubr.msk.f32.mxu1 %vm2677_vm4, %v2676_v10 }
0x157a   :  { %2506 = vmatprep.subr.bf16.mxu1 %v2682_v3 }
0x157d   :  { %2508 = vmatpush3.bf16.msra.mxu1 %v2507_v16 }
0x157e   :  { %2509 = vmatprep.subr.bf16.mxu1 %v2682_v3 }
0x1580   :  { %2423 = vmatmul.mubr.msk.f32.vlgmr.msra.gmra.mrb[28].mxu1 %vm153_vm3, %v1664_v53 }
0x1581   :  { %2511 = vmatpush3.bf16.msra.mxu1 %v2510_v50  ;;  %2433 = vmatprep.mubr.msk.f32.mxu1 %vm2677_vm4, %v2676_v10 }
0x1582   :  { %2512 = vmatprep.subr.bf16.mxu1 %v2682_v3 }
0x1585   :  { %2514 = vmatpush3.bf16.msra.mxu1 %v2513_v54 }
0x1586   :  { %2515 = vmatprep.subr.bf16.mxu1 %v2682_v3 }
0x1588   :  { %2434 = vmatmul.mubr.msk.f32.vlgmr.msra.gmra.mrb[28].mxu1 %vm153_vm3, %v1745_v2 }
0x1589   :  { %2517 = vmatpush3.bf16.msra.mxu1 %v2516_v0  ;;  %2444 = vmatprep.mubr.msk.f32.mxu1 %vm2677_vm4, %v2676_v10 }
0x158a   :  { %2518 = vmatprep.subr.bf16.mxu1 %v2682_v3 }
0x158d   :  { %2520 = vmatpush3.bf16.msra.mxu1 %v2519_v40 }
0x158e   :  { %2521 = vmatprep.subr.bf16.mxu1 %v2682_v3 }
0x1590   :  { %2445 = vmatmul.mubr.msk.f32.vlgmr.msra.gmra.mrb[28].mxu1 %vm153_vm3, %v1826_v62 }
0x1591   :  { %2523 = vmatpush3.bf16.msra.mxu1 %v2522_v45  ;;  %2455 = vmatprep.mubr.msk.f32.mxu1 %vm2677_vm4, %v2676_v10 }
0x1592   :  { %2524 = vmatprep.subr.bf16.mxu1 %v2682_v3 }
0x1595   :  { %2526 = vmatpush3.bf16.msra.mxu1 %v2525_v11 }
0x1596   :  { %2527 = vmatprep.subr.bf16.mxu1 %v2682_v3 }
0x1598   :  { %2456 = vmatmul.mubr.msk.f32.vlgmr.msra.gmra.mrb[28].mxu1 %vm153_vm3, %v1907_v23 }
0x1599   :  { %2529 = vmatpush3.bf16.msra.mxu1 %v2528_v60  ;;  %2466 = vmatprep.mubr.msk.f32.mxu1 %vm2677_vm4, %v2676_v10 }
0x159a   :  { %2530 = vmatprep.subr.bf16.mxu1 %v2682_v3 }
0x159d   :  { %2532 = vmatpush3.bf16.msra.mxu1 %v2531_v24 }
0x15a0   :  { %2467 = vmatmul.mubr.msk.f32.vlgmr.msra.gmra.mrb[28].mxu1 %vm153_vm3, %v1988_v27 }
0x1645   :  { %v1491_v28 = vpop.f32.mrb[2].mxu0 }
0x1646   :  { %v2391_v30 = vpop.f32.mrb[3].mxu0  ;;  %v1495_v10 = vadd.f32 %v2135_v31, %v1491_v28 }
0x1673   :  { %v2057_v34 = vpop.f32.mrb[28].mxu1 }
0x1674   :  { %v2534_v3 = vadd.f32 %v2057_v34, %v1495_v10  ;;  %v2468_v39 = vpop.f32.mrb[29].mxu1 }
0x1676   :  { %2063 = vst.msk [vmem:[#allocation5] sm:$0x3] %vm2062_vm8, %v2534_v3 }
0x1677   :  { %2657 = shalt.err (!%p2654_p12)
}
0x1678   :  { %s2658_s2 = scalar_lea.hbm %s3162_s7, 32 }
0x1679   :  { %p2659_p13 = scmp.ne.s32.totalorder %s3162_s7, %s2658_s2  ;;  %p2662_p0 = scmp.lt.u32.totalorder %s2658_s2, %s3162_s7 }
0x167b   :  { %p2664_p1 = pnand %p2662_p0, %p2659_p13 }
0x167d   :  { %2667 = shalt.err (!%p2664_p1)
}
0x167e   :  { %2073 = dma.vmem_to_hbm [thread:$0]  %s2071_s29, 32, %s3162_s7, [#allocation4]  }
0x167f   :  { %2670 = dma.done.wait [#allocation4], 32  }
0x1680   :  { %2671 = vsyncadd [#allocation4], 4294967264 }
0x1681   :  { %2077 = vsyncpa [#allocation3], 1 }
0x1682   :  { %2078 = vsyncpa [#allocation4], 1 }

</bundles_post_ra>
